<compile_context>
chip_gen: v7x
topology: tpu7x:2x2x1
jax: 0.10.0
libtpu: 0.0.40
codegen_flags: <defaults>
</compile_context>

<pallas_src>
import jax
import jax.numpy as jnp
from jax.experimental import pallas as pl
from jax.experimental.pallas import tpu as pltpu

HIDDEN = 64          # GRU hidden size (fixed by the module)
BS_PAD = 8           # batch padded to one f32 sublane tile
GATE_W = 256         # fused gate width: [r(0:64) | z(64:128) | n(128:192) | pad(192:256)]


def _gru_wp_kernel(x_ref, tp_ref, wenc_ref, benc_ref, wih_ref, whh_ref,
                   bi_ref, bhn_ref, wdec_ref, bramp_ref, out_ref,
                   gi_ref, hsum_ref):
    TB = x_ref.shape[0]            # T * BS_PAD
    BSP = tp_ref.shape[0]          # padded batch rows (8)
    H = wenc_ref.shape[1]          # 64
    T = TB // BSP

    def sigmoid(v):
        # logistic(v) == 0.5*(tanh(v/2)+1): tanh runs on the EUP (its own VLIW
        # slot), keeping the recurrence critical path free of VPU divides.
        return 0.5 * (jnp.tanh(0.5 * v) + 1.0)

    # Encoder: h0 = target_point @ W_enc + b_enc (computed exactly once, f32).
    h = jnp.dot(tp_ref[...], wenc_ref[...],
                preferred_element_type=jnp.float32) + benc_ref[...]       # (BSP, H)

    # Hoisted input projections for every timestep, written to VMEM scratch to
    # bound the vreg live range across the unrolled loop (per-step (8,256) loads
    # are cheap and fully hidden behind the MXU).
    gi_ref[...] = jnp.dot(x_ref[...], wih_ref[...],
                          preferred_element_type=jnp.float32) + bi_ref[...]  # (TB, 256)

    whh = whh_ref[...]                                    # (H, 256) bf16, fused [r|z|n|0]
    bhn = jnp.broadcast_to(bhn_ref[...], (BSP, H))        # hoisted: no per-step broadcast_in_dim

    hcum = jnp.zeros_like(h)
    for t in range(T):             # static unroll; one MXU matmul per step on the serial chain
        gi = gi_ref[pl.ds(t * BSP, BSP), :]                               # aligned (8, 256) load
        gh = jnp.dot(h.astype(jnp.bfloat16), whh,
                     preferred_element_type=jnp.float32)                  # bf16 MXU, f32 acc
        rz = sigmoid(gi[:, :2 * H] + gh[:, :2 * H])       # r|z together: one full 128-lane vreg
        r = rz[:, :H]
        z = rz[:, H:2 * H]
        n = jnp.tanh(gi[:, 2 * H:3 * H] + r * (gh[:, 2 * H:3 * H] + bhn))  # n block is vreg-aligned
        h = (1.0 - z) * n + z * h                          # carried state stays f32
        hcum = hcum + h                                    # running sum -> waypoint cumsum
        hsum_ref[pl.ds(t * BSP, BSP), :] = hcum            # full (8,·) store, vst slot (hidden)

    # Decoder applied once to all cumulative hidden sums:
    #   cumsum_t(h_t @ W_dec + b_dec) == (cumsum_t h_t) @ W_dec + (t+1)*b_dec
    out_ref[...] = jnp.dot(hsum_ref[...], wdec_ref[...],
                           preferred_element_type=jnp.float32) + bramp_ref[...]


def prepare_params(params, waypoints, bs_pad=BS_PAD, gate_w=GATE_W):
    """One-time parameter prep (gate fusion, bias folding, padding, bias ramp, casts)."""
    f32 = jnp.float32
    H = HIDDEN
    D = params["W_ih"].shape[1]
    pad = gate_w - 3 * H

    # Fused [r|z|n] gate matrices, zero-padded to 256 columns (lane-aligned slices).
    w_ih = jnp.concatenate(
        [params["W_ih"][0], params["W_ih"][1], params["W_ih"][2],
         jnp.zeros((D, pad), f32)], axis=1).astype(f32)                    # (D, 256)
    w_hh = jnp.concatenate(
        [params["W_hh"][0], params["W_hh"][1], params["W_hh"][2],
         jnp.zeros((H, pad), f32)], axis=1).astype(jnp.bfloat16)           # (H, 256) bf16 MXU operand
    # Fold b_hh into b_ih for r and z; b_hn stays separate (inside r*(W_hn h + b_hn)).
    b_i = jnp.concatenate(
        [params["b_ih"][0] + params["b_hh"][0],
         params["b_ih"][1] + params["b_hh"][1],
         params["b_ih"][2],
         jnp.zeros((pad,), f32)], axis=0).reshape(1, gate_w).astype(f32)   # (1, 256)
    b_hn = params["b_hh"][2].reshape(1, H).astype(f32)                     # (1, H)

    # Cumsum-folded decoder bias: row (t*bs_pad + b) gets (t+1) * b_dec.
    steps = jnp.arange(1, waypoints + 1, dtype=f32)[:, None, None]
    b_ramp = jnp.broadcast_to(steps * params["b_dec"].astype(f32)[None, None, :],
                              (waypoints, bs_pad, 2)).reshape(waypoints * bs_pad, 2)

    return dict(
        w_enc=params["W_enc"].astype(f32),
        b_enc=params["b_enc"].reshape(1, H).astype(f32),
        w_ih=w_ih, w_hh=w_hh, b_i=b_i, b_hn=b_hn,
        w_dec=params["W_dec"].astype(f32),
        b_ramp=b_ramp,
    )


@jax.jit
def gru_waypoints_forward(x, target_point, prepped):
    """x: (bs, T, D), target_point: (bs, 2), prepped = prepare_params(...)."""
    bs, T, D = x.shape
    f32 = jnp.float32
    assert bs <= BS_PAD, "add a parallel batch grid axis for larger batches"

    # Time-major, batch zero-padded to a full f32 sublane tile (8 rows):
    # row t*BS_PAD + b  <->  x[b, t].  Padded rows are independent garbage and
    # are dropped below; they never mix with real rows (all ops are row-wise).
    x_tm = jnp.transpose(x.astype(f32), (1, 0, 2))                         # (T, bs, D)
    x_tm = jnp.pad(x_tm, ((0, 0), (0, BS_PAD - bs), (0, 0))).reshape(T * BS_PAD, D)
    tp = jnp.pad(target_point.astype(f32), ((0, BS_PAD - bs), (0, 0)))     # (8, 2)

    out_flat = pl.pallas_call(
        _gru_wp_kernel,
        out_shape=jax.ShapeDtypeStruct((T * BS_PAD, 2), f32),
        scratch_shapes=[pltpu.VMEM((T * BS_PAD, GATE_W), f32),   # hoisted gate pre-activations
                        pltpu.VMEM((T * BS_PAD, HIDDEN), f32)],  # running hidden-state cumsum
    )(x_tm, tp, prepped["w_enc"], prepped["b_enc"], prepped["w_ih"],
      prepped["w_hh"], prepped["b_i"], prepped["b_hn"], prepped["w_dec"],
      prepped["b_ramp"])

    # Drop padded batch rows, back to PyTorch layout (bs, T, 2).
    return out_flat.reshape(T, BS_PAD, 2)[:, :bs, :].transpose(1, 0, 2)


def init_params(key, input_dim):
    keys = jax.random.split(key, 8)
    k_gru = HIDDEN ** -0.5
    k_enc = 2 ** -0.5

    def u(k, shape, scale):
        return jax.random.uniform(k, shape, jnp.float32, -scale, scale)

    return dict(
        W_enc=u(keys[0], (2, HIDDEN), k_enc),
        b_enc=u(keys[1], (HIDDEN,), k_enc),
        W_ih=u(keys[2], (3, input_dim, HIDDEN), k_gru),   # gates [r, z, n]
        W_hh=u(keys[3], (3, HIDDEN, HIDDEN), k_gru),
        b_ih=u(keys[4], (3, HIDDEN), k_gru),
        b_hh=u(keys[5], (3, HIDDEN), k_gru),
        W_dec=u(keys[6], (HIDDEN, 2), k_gru),
        b_dec=u(keys[7], (2,), k_gru),
    )


def reference(x, target_point, p):
    """Pure-JAX f32 mirror of the PyTorch forward (semantic check)."""
    bs, T, D = x.shape
    h = target_point @ p["W_enc"] + p["b_enc"]
    hs = []
    for t in range(T):
        xt = x[:, t, :]
        r = jax.nn.sigmoid(xt @ p["W_ih"][0] + p["b_ih"][0]
                           + h @ p["W_hh"][0] + p["b_hh"][0])
        z = jax.nn.sigmoid(xt @ p["W_ih"][1] + p["b_ih"][1]
                           + h @ p["W_hh"][1] + p["b_hh"][1])
        n = jnp.tanh(xt @ p["W_ih"][2] + p["b_ih"][2]
                     + r * (h @ p["W_hh"][2] + p["b_hh"][2]))
        h = (1.0 - z) * n + z * h
        hs.append(h)
    out = jnp.stack(hs, axis=1) @ p["W_dec"] + p["b_dec"]
    return jnp.cumsum(out, axis=1)


def reference_bf16_matched(x, target_point, p):
    """Mirror of the kernel's numerics (bf16 recurrent-matmul operands, f32
    accumulation / state, tanh-form sigmoid) for a tighter logic check."""
    f32, bf16 = jnp.float32, jnp.bfloat16
    bs, T, D = x.shape
    sig = lambda v: 0.5 * (jnp.tanh(0.5 * v) + 1.0)
    whh = p["W_hh"].astype(bf16)
    h = target_point @ p["W_enc"] + p["b_enc"]
    hs = []
    for t in range(T):
        xt = x[:, t, :]
        gh = [jnp.dot(h.astype(bf16), whh[g], preferred_element_type=f32)
              for g in range(3)]
        r = sig(xt @ p["W_ih"][0] + p["b_ih"][0] + gh[0] + p["b_hh"][0])
        z = sig(xt @ p["W_ih"][1] + p["b_ih"][1] + gh[1] + p["b_hh"][1])
        n = jnp.tanh(xt @ p["W_ih"][2] + p["b_ih"][2] + r * (gh[2] + p["b_hh"][2]))
        h = (1.0 - z) * n + z * h
        hs.append(h)
    out = jnp.stack(hs, axis=1) @ p["W_dec"] + p["b_dec"]
    return jnp.cumsum(out, axis=1)


if __name__ == "__main__":
    key = jax.random.PRNGKey(0)
    kx, kt, kp = jax.random.split(key, 3)
    bs, waypoints, input_dim = 2, 10, 32

    x = jax.random.normal(kx, (bs, waypoints, input_dim), jnp.float32)
    target_point = jax.random.normal(kt, (bs, 2), jnp.float32)
    params = init_params(kp, input_dim)

    prepped = prepare_params(params, waypoints)            # one-time weight prep
    out = gru_waypoints_forward(x, target_point, prepped)  # single jitted dispatch
    out = jax.block_until_ready(out)
    assert out.shape == (bs, waypoints, 2)

    with jax.default_matmul_precision("highest"):
        ref_m = reference_bf16_matched(x, target_point, params)
        ref_f32 = reference(x, target_point, params)

    # Logic check vs. a reference sharing the kernel's bf16-MXU-operand numerics.
    err_m = float(jnp.max(jnp.abs(out - ref_m)))
    assert jnp.allclose(out, ref_m, atol=7.5e-3, rtol=7.5e-3), err_m
    # Semantic check vs. the pure-f32 PyTorch-faithful reference (looser tolerance
    # because the recurrent matmul operands are bf16, per the performance review).
    err = float(jnp.max(jnp.abs(out - ref_f32)))
    assert jnp.allclose(out, ref_f32, atol=5e-2, rtol=5e-2), err

    print("KERNEL_OK")
</pallas_src>

<mosaic_0001>
module attributes {stable_mosaic.version = 11 : i64} {
  func.func @_gru_wp_kernel(%arg0: memref<80x32xf32, #tpu.memory_space<vmem>>, %arg1: memref<8x2xf32, #tpu.memory_space<vmem>>, %arg2: memref<2x64xf32, #tpu.memory_space<vmem>>, %arg3: memref<1x64xf32, #tpu.memory_space<vmem>>, %arg4: memref<32x256xf32, #tpu.memory_space<vmem>>, %arg5: memref<64x256xbf16, #tpu.memory_space<vmem>>, %arg6: memref<1x256xf32, #tpu.memory_space<vmem>>, %arg7: memref<1x64xf32, #tpu.memory_space<vmem>>, %arg8: memref<64x2xf32, #tpu.memory_space<vmem>>, %arg9: memref<80x2xf32, #tpu.memory_space<vmem>>, %arg10: memref<80x2xf32, #tpu.memory_space<vmem>>, %arg11: memref<80x256xf32, #tpu.memory_space<vmem>>, %arg12: memref<80x64xf32, #tpu.memory_space<vmem>>) attributes {dimension_semantics = [], scalar_prefetch = 0 : i64, scratch_operands = 2 : i64, tpu.core_type = #tpu.core_type<tc>} {
    %c0 = arith.constant 0 : index
    %c0_0 = arith.constant 0 : index
    %0 = vector.load %arg1[%c0, %c0_0] : memref<8x2xf32, #tpu.memory_space<vmem>>, vector<8x2xf32>
    %c0_1 = arith.constant 0 : index
    %c0_2 = arith.constant 0 : index
    %1 = vector.load %arg2[%c0_1, %c0_2] : memref<2x64xf32, #tpu.memory_space<vmem>>, vector<2x64xf32>
    %cst = arith.constant dense<0.000000e+00> : vector<8x64xf32>
    %2 = tpu.matmul %0, %1, %cst {dimension_numbers = #tpu.dot_dimension_numbers<[1], [0], [0], [1], [0, 0, 1, 1], [], []>} : vector<8x2xf32>, vector<2x64xf32>, vector<8x64xf32> -> vector<8x64xf32>
    %c0_3 = arith.constant 0 : index
    %c0_4 = arith.constant 0 : index
    %3 = vector.load %arg3[%c0_3, %c0_4] : memref<1x64xf32, #tpu.memory_space<vmem>>, vector<1x64xf32>
    %4 = vector.broadcast %3 : vector<1x64xf32> to vector<8x64xf32>
    %5 = arith.addf %2, %4 : vector<8x64xf32>
    %c0_5 = arith.constant 0 : index
    %c0_6 = arith.constant 0 : index
    %6 = vector.load %arg0[%c0_5, %c0_6] : memref<80x32xf32, #tpu.memory_space<vmem>>, vector<80x32xf32>
    %c0_7 = arith.constant 0 : index
    %c0_8 = arith.constant 0 : index
    %7 = vector.load %arg4[%c0_7, %c0_8] : memref<32x256xf32, #tpu.memory_space<vmem>>, vector<32x256xf32>
    %cst_9 = arith.constant dense<0.000000e+00> : vector<80x256xf32>
    %8 = tpu.matmul %6, %7, %cst_9 {dimension_numbers = #tpu.dot_dimension_numbers<[1], [0], [0], [1], [0, 0, 1, 1], [], []>} : vector<80x32xf32>, vector<32x256xf32>, vector<80x256xf32> -> vector<80x256xf32>
    %c0_10 = arith.constant 0 : index
    %c0_11 = arith.constant 0 : index
    %9 = vector.load %arg6[%c0_10, %c0_11] : memref<1x256xf32, #tpu.memory_space<vmem>>, vector<1x256xf32>
    %10 = vector.broadcast %9 : vector<1x256xf32> to vector<80x256xf32>
    %11 = arith.addf %8, %10 : vector<80x256xf32>
    %c0_12 = arith.constant 0 : index
    %c0_13 = arith.constant 0 : index
    %12 = vector.load %arg11[%c0_12, %c0_13] : memref<80x256xf32, #tpu.memory_space<vmem>>, vector<80x256xf32>
    tpu.vector_store %arg11[%c0_12, %c0_13], %11 {strides = array<i32>} : memref<80x256xf32, #tpu.memory_space<vmem>>, vector<80x256xf32>,
    %c0_14 = arith.constant 0 : index
    %c0_15 = arith.constant 0 : index
    %13 = vector.load %arg5[%c0_14, %c0_15] : memref<64x256xbf16, #tpu.memory_space<vmem>>, vector<64x256xbf16>
    %c0_16 = arith.constant 0 : index
    %c0_17 = arith.constant 0 : index
    %14 = vector.load %arg7[%c0_16, %c0_17] : memref<1x64xf32, #tpu.memory_space<vmem>>, vector<1x64xf32>
    %15 = vector.shape_cast %14 : vector<1x64xf32> to vector<1x64xf32>
    %16 = vector.broadcast %15 : vector<1x64xf32> to vector<8x64xf32>
    %cst_18 = arith.constant 0.000000e+00 : f32
    %17 = vector.broadcast %cst_18 : f32 to vector<8x64xf32>
    %c0_19 = arith.constant 0 : index
    %c0_20 = arith.constant 0 : index
    %18 = vector.load %arg11[%c0_19, %c0_20] : memref<80x256xf32, #tpu.memory_space<vmem>>, vector<8x256xf32>
    %19 = arith.truncf %5 : vector<8x64xf32> to vector<8x64xbf16>
    %cst_21 = arith.constant dense<0.000000e+00> : vector<8x256xf32>
    %20 = tpu.matmul %19, %13, %cst_21 {dimension_numbers = #tpu.dot_dimension_numbers<[1], [0], [0], [1], [0, 0, 1, 1], [], []>} : vector<8x64xbf16>, vector<64x256xbf16>, vector<8x256xf32> -> vector<8x256xf32>
    %21 = vector.extract_strided_slice %18 {offsets = [0, 0], sizes = [8, 128], strides = [1, 1]} : vector<8x256xf32> to vector<8x128xf32>
    %22 = vector.extract_strided_slice %20 {offsets = [0, 0], sizes = [8, 128], strides = [1, 1]} : vector<8x256xf32> to vector<8x128xf32>
    %23 = arith.addf %21, %22 : vector<8x128xf32>
    %cst_22 = arith.constant 5.000000e-01 : f32
    %24 = vector.broadcast %cst_22 : f32 to vector<8x128xf32>
    %25 = arith.mulf %24, %23 : vector<8x128xf32>
    %26 = math.tanh %25 : vector<8x128xf32>
    %cst_23 = arith.constant 1.000000e+00 : f32
    %27 = vector.broadcast %cst_23 : f32 to vector<8x128xf32>
    %28 = arith.addf %26, %27 : vector<8x128xf32>
    %cst_24 = arith.constant 5.000000e-01 : f32
    %29 = vector.broadcast %cst_24 : f32 to vector<8x128xf32>
    %30 = arith.mulf %29, %28 : vector<8x128xf32>
    %31 = vector.extract_strided_slice %30 {offsets = [0, 0], sizes = [8, 64], strides = [1, 1]} : vector<8x128xf32> to vector<8x64xf32>
    %32 = vector.extract_strided_slice %30 {offsets = [0, 64], sizes = [8, 64], strides = [1, 1]} : vector<8x128xf32> to vector<8x64xf32>
    %33 = vector.extract_strided_slice %18 {offsets = [0, 128], sizes = [8, 64], strides = [1, 1]} : vector<8x256xf32> to vector<8x64xf32>
    %34 = vector.extract_strided_slice %20 {offsets = [0, 128], sizes = [8, 64], strides = [1, 1]} : vector<8x256xf32> to vector<8x64xf32>
    %35 = arith.addf %34, %16 : vector<8x64xf32>
    %36 = arith.mulf %31, %35 : vector<8x64xf32>
    %37 = arith.addf %33, %36 : vector<8x64xf32>
    %38 = math.tanh %37 : vector<8x64xf32>
    %cst_25 = arith.constant 1.000000e+00 : f32
    %39 = vector.broadcast %cst_25 : f32 to vector<8x64xf32>
    %40 = arith.subf %39, %32 : vector<8x64xf32>
    %41 = arith.mulf %40, %38 : vector<8x64xf32>
    %42 = arith.mulf %32, %5 : vector<8x64xf32>
    %43 = arith.addf %41, %42 : vector<8x64xf32>
    %44 = arith.addf %17, %43 : vector<8x64xf32>
    %c0_26 = arith.constant 0 : index
    %c0_27 = arith.constant 0 : index
    %45 = vector.load %arg12[%c0_26, %c0_27] : memref<80x64xf32, #tpu.memory_space<vmem>>, vector<8x64xf32>
    tpu.vector_store %arg12[%c0_26, %c0_27], %44 {strides = array<i32>} : memref<80x64xf32, #tpu.memory_space<vmem>>, vector<8x64xf32>,
    %c8 = arith.constant 8 : index
    %c0_28 = arith.constant 0 : index
    %46 = vector.load %arg11[%c8, %c0_28] : memref<80x256xf32, #tpu.memory_space<vmem>>, vector<8x256xf32>
    %47 = arith.truncf %43 : vector<8x64xf32> to vector<8x64xbf16>
    %cst_29 = arith.constant dense<0.000000e+00> : vector<8x256xf32>
    %48 = tpu.matmul %47, %13, %cst_29 {dimension_numbers = #tpu.dot_dimension_numbers<[1], [0], [0], [1], [0, 0, 1, 1], [], []>} : vector<8x64xbf16>, vector<64x256xbf16>, vector<8x256xf32> -> vector<8x256xf32>
    %49 = vector.extract_strided_slice %46 {offsets = [0, 0], sizes = [8, 128], strides = [1, 1]} : vector<8x256xf32> to vector<8x128xf32>
    %50 = vector.extract_strided_slice %48 {offsets = [0, 0], sizes = [8, 128], strides = [1, 1]} : vector<8x256xf32> to vector<8x128xf32>
    %51 = arith.addf %49, %50 : vector<8x128xf32>
    %cst_30 = arith.constant 5.000000e-01 : f32
    %52 = vector.broadcast %cst_30 : f32 to vector<8x128xf32>
    %53 = arith.mulf %52, %51 : vector<8x128xf32>
    %54 = math.tanh %53 : vector<8x128xf32>
    %cst_31 = arith.constant 1.000000e+00 : f32
    %55 = vector.broadcast %cst_31 : f32 to vector<8x128xf32>
    %56 = arith.addf %54, %55 : vector<8x128xf32>
    %cst_32 = arith.constant 5.000000e-01 : f32
    %57 = vector.broadcast %cst_32 : f32 to vector<8x128xf32>
    %58 = arith.mulf %57, %56 : vector<8x128xf32>
    %59 = vector.extract_strided_slice %58 {offsets = [0, 0], sizes = [8, 64], strides = [1, 1]} : vector<8x128xf32> to vector<8x64xf32>
    %60 = vector.extract_strided_slice %58 {offsets = [0, 64], sizes = [8, 64], strides = [1, 1]} : vector<8x128xf32> to vector<8x64xf32>
    %61 = vector.extract_strided_slice %46 {offsets = [0, 128], sizes = [8, 64], strides = [1, 1]} : vector<8x256xf32> to vector<8x64xf32>
    %62 = vector.extract_strided_slice %48 {offsets = [0, 128], sizes = [8, 64], strides = [1, 1]} : vector<8x256xf32> to vector<8x64xf32>
    %63 = arith.addf %62, %16 : vector<8x64xf32>
    %64 = arith.mulf %59, %63 : vector<8x64xf32>
    %65 = arith.addf %61, %64 : vector<8x64xf32>
    %66 = math.tanh %65 : vector<8x64xf32>
    %cst_33 = arith.constant 1.000000e+00 : f32
    %67 = vector.broadcast %cst_33 : f32 to vector<8x64xf32>
    %68 = arith.subf %67, %60 : vector<8x64xf32>
    %69 = arith.mulf %68, %66 : vector<8x64xf32>
    %70 = arith.mulf %60, %43 : vector<8x64xf32>
    %71 = arith.addf %69, %70 : vector<8x64xf32>
    %72 = arith.addf %44, %71 : vector<8x64xf32>
    %c8_34 = arith.constant 8 : index
    %c0_35 = arith.constant 0 : index
    %73 = vector.load %arg12[%c8_34, %c0_35] : memref<80x64xf32, #tpu.memory_space<vmem>>, vector<8x64xf32>
    tpu.vector_store %arg12[%c8_34, %c0_35], %72 {strides = array<i32>} : memref<80x64xf32, #tpu.memory_space<vmem>>, vector<8x64xf32>,
    %c16 = arith.constant 16 : index
    %c0_36 = arith.constant 0 : index
    %74 = vector.load %arg11[%c16, %c0_36] : memref<80x256xf32, #tpu.memory_space<vmem>>, vector<8x256xf32>
    %75 = arith.truncf %71 : vector<8x64xf32> to vector<8x64xbf16>
    %cst_37 = arith.constant dense<0.000000e+00> : vector<8x256xf32>
    %76 = tpu.matmul %75, %13, %cst_37 {dimension_numbers = #tpu.dot_dimension_numbers<[1], [0], [0], [1], [0, 0, 1, 1], [], []>} : vector<8x64xbf16>, vector<64x256xbf16>, vector<8x256xf32> -> vector<8x256xf32>
    %77 = vector.extract_strided_slice %74 {offsets = [0, 0], sizes = [8, 128], strides = [1, 1]} : vector<8x256xf32> to vector<8x128xf32>
    %78 = vector.extract_strided_slice %76 {offsets = [0, 0], sizes = [8, 128], strides = [1, 1]} : vector<8x256xf32> to vector<8x128xf32>
    %79 = arith.addf %77, %78 : vector<8x128xf32>
    %cst_38 = arith.constant 5.000000e-01 : f32
    %80 = vector.broadcast %cst_38 : f32 to vector<8x128xf32>
    %81 = arith.mulf %80, %79 : vector<8x128xf32>
    %82 = math.tanh %81 : vector<8x128xf32>
    %cst_39 = arith.constant 1.000000e+00 : f32
    %83 = vector.broadcast %cst_39 : f32 to vector<8x128xf32>
    %84 = arith.addf %82, %83 : vector<8x128xf32>
    %cst_40 = arith.constant 5.000000e-01 : f32
    %85 = vector.broadcast %cst_40 : f32 to vector<8x128xf32>
    %86 = arith.mulf %85, %84 : vector<8x128xf32>
    %87 = vector.extract_strided_slice %86 {offsets = [0, 0], sizes = [8, 64], strides = [1, 1]} : vector<8x128xf32> to vector<8x64xf32>
    %88 = vector.extract_strided_slice %86 {offsets = [0, 64], sizes = [8, 64], strides = [1, 1]} : vector<8x128xf32> to vector<8x64xf32>
    %89 = vector.extract_strided_slice %74 {offsets = [0, 128], sizes = [8, 64], strides = [1, 1]} : vector<8x256xf32> to vector<8x64xf32>
    %90 = vector.extract_strided_slice %76 {offsets = [0, 128], sizes = [8, 64], strides = [1, 1]} : vector<8x256xf32> to vector<8x64xf32>
    %91 = arith.addf %90, %16 : vector<8x64xf32>
    %92 = arith.mulf %87, %91 : vector<8x64xf32>
    %93 = arith.addf %89, %92 : vector<8x64xf32>
    %94 = math.tanh %93 : vector<8x64xf32>
    %cst_41 = arith.constant 1.000000e+00 : f32
    %95 = vector.broadcast %cst_41 : f32 to vector<8x64xf32>
    %96 = arith.subf %95, %88 : vector<8x64xf32>
    %97 = arith.mulf %96, %94 : vector<8x64xf32>
    %98 = arith.mulf %88, %71 : vector<8x64xf32>
    %99 = arith.addf %97, %98 : vector<8x64xf32>
    %100 = arith.addf %72, %99 : vector<8x64xf32>
    %c16_42 = arith.constant 16 : index
    %c0_43 = arith.constant 0 : index
    %101 = vector.load %arg12[%c16_42, %c0_43] : memref<80x64xf32, #tpu.memory_space<vmem>>, vector<8x64xf32>
    tpu.vector_store %arg12[%c16_42, %c0_43], %100 {strides = array<i32>} : memref<80x64xf32, #tpu.memory_space<vmem>>, vector<8x64xf32>,
    %c24 = arith.constant 24 : index
    %c0_44 = arith.constant 0 : index
    %102 = vector.load %arg11[%c24, %c0_44] : memref<80x256xf32, #tpu.memory_space<vmem>>, vector<8x256xf32>
    %103 = arith.truncf %99 : vector<8x64xf32> to vector<8x64xbf16>
    %cst_45 = arith.constant dense<0.000000e+00> : vector<8x256xf32>
    %104 = tpu.matmul %103, %13, %cst_45 {dimension_numbers = #tpu.dot_dimension_numbers<[1], [0], [0], [1], [0, 0, 1, 1], [], []>} : vector<8x64xbf16>, vector<64x256xbf16>, vector<8x256xf32> -> vector<8x256xf32>
    %105 = vector.extract_strided_slice %102 {offsets = [0, 0], sizes = [8, 128], strides = [1, 1]} : vector<8x256xf32> to vector<8x128xf32>
    %106 = vector.extract_strided_slice %104 {offsets = [0, 0], sizes = [8, 128], strides = [1, 1]} : vector<8x256xf32> to vector<8x128xf32>
    %107 = arith.addf %105, %106 : vector<8x128xf32>
    %cst_46 = arith.constant 5.000000e-01 : f32
    %108 = vector.broadcast %cst_46 : f32 to vector<8x128xf32>
    %109 = arith.mulf %108, %107 : vector<8x128xf32>
    %110 = math.tanh %109 : vector<8x128xf32>
    %cst_47 = arith.constant 1.000000e+00 : f32
    %111 = vector.broadcast %cst_47 : f32 to vector<8x128xf32>
    %112 = arith.addf %110, %111 : vector<8x128xf32>
    %cst_48 = arith.constant 5.000000e-01 : f32
    %113 = vector.broadcast %cst_48 : f32 to vector<8x128xf32>
    %114 = arith.mulf %113, %112 : vector<8x128xf32>
    %115 = vector.extract_strided_slice %114 {offsets = [0, 0], sizes = [8, 64], strides = [1, 1]} : vector<8x128xf32> to vector<8x64xf32>
    %116 = vector.extract_strided_slice %114 {offsets = [0, 64], sizes = [8, 64], strides = [1, 1]} : vector<8x128xf32> to vector<8x64xf32>
    %117 = vector.extract_strided_slice %102 {offsets = [0, 128], sizes = [8, 64], strides = [1, 1]} : vector<8x256xf32> to vector<8x64xf32>
    %118 = vector.extract_strided_slice %104 {offsets = [0, 128], sizes = [8, 64], strides = [1, 1]} : vector<8x256xf32> to vector<8x64xf32>
    %119 = arith.addf %118, %16 : vector<8x64xf32>
    %120 = arith.mulf %115, %119 : vector<8x64xf32>
    %121 = arith.addf %117, %120 : vector<8x64xf32>
    %122 = math.tanh %121 : vector<8x64xf32>
    %cst_49 = arith.constant 1.000000e+00 : f32
    %123 = vector.broadcast %cst_49 : f32 to vector<8x64xf32>
    %124 = arith.subf %123, %116 : vector<8x64xf32>
    %125 = arith.mulf %124, %122 : vector<8x64xf32>
    %126 = arith.mulf %116, %99 : vector<8x64xf32>
    %127 = arith.addf %125, %126 : vector<8x64xf32>
    %128 = arith.addf %100, %127 : vector<8x64xf32>
    %c24_50 = arith.constant 24 : index
    %c0_51 = arith.constant 0 : index
    %129 = vector.load %arg12[%c24_50, %c0_51] : memref<80x64xf32, #tpu.memory_space<vmem>>, vector<8x64xf32>
    tpu.vector_store %arg12[%c24_50, %c0_51], %128 {strides = array<i32>} : memref<80x64xf32, #tpu.memory_space<vmem>>, vector<8x64xf32>,
    %c32 = arith.constant 32 : index
    %c0_52 = arith.constant 0 : index
    %130 = vector.load %arg11[%c32, %c0_52] : memref<80x256xf32, #tpu.memory_space<vmem>>, vector<8x256xf32>
    %131 = arith.truncf %127 : vector<8x64xf32> to vector<8x64xbf16>
    %cst_53 = arith.constant dense<0.000000e+00> : vector<8x256xf32>
    %132 = tpu.matmul %131, %13, %cst_53 {dimension_numbers = #tpu.dot_dimension_numbers<[1], [0], [0], [1], [0, 0, 1, 1], [], []>} : vector<8x64xbf16>, vector<64x256xbf16>, vector<8x256xf32> -> vector<8x256xf32>
    %133 = vector.extract_strided_slice %130 {offsets = [0, 0], sizes = [8, 128], strides = [1, 1]} : vector<8x256xf32> to vector<8x128xf32>
    %134 = vector.extract_strided_slice %132 {offsets = [0, 0], sizes = [8, 128], strides = [1, 1]} : vector<8x256xf32> to vector<8x128xf32>
    %135 = arith.addf %133, %134 : vector<8x128xf32>
    %cst_54 = arith.constant 5.000000e-01 : f32
    %136 = vector.broadcast %cst_54 : f32 to vector<8x128xf32>
    %137 = arith.mulf %136, %135 : vector<8x128xf32>
    %138 = math.tanh %137 : vector<8x128xf32>
    %cst_55 = arith.constant 1.000000e+00 : f32
    %139 = vector.broadcast %cst_55 : f32 to vector<8x128xf32>
    %140 = arith.addf %138, %139 : vector<8x128xf32>
    %cst_56 = arith.constant 5.000000e-01 : f32
    %141 = vector.broadcast %cst_56 : f32 to vector<8x128xf32>
    %142 = arith.mulf %141, %140 : vector<8x128xf32>
    %143 = vector.extract_strided_slice %142 {offsets = [0, 0], sizes = [8, 64], strides = [1, 1]} : vector<8x128xf32> to vector<8x64xf32>
    %144 = vector.extract_strided_slice %142 {offsets = [0, 64], sizes = [8, 64], strides = [1, 1]} : vector<8x128xf32> to vector<8x64xf32>
    %145 = vector.extract_strided_slice %130 {offsets = [0, 128], sizes = [8, 64], strides = [1, 1]} : vector<8x256xf32> to vector<8x64xf32>
    %146 = vector.extract_strided_slice %132 {offsets = [0, 128], sizes = [8, 64], strides = [1, 1]} : vector<8x256xf32> to vector<8x64xf32>
    %147 = arith.addf %146, %16 : vector<8x64xf32>
    %148 = arith.mulf %143, %147 : vector<8x64xf32>
    %149 = arith.addf %145, %148 : vector<8x64xf32>
    %150 = math.tanh %149 : vector<8x64xf32>
    %cst_57 = arith.constant 1.000000e+00 : f32
    %151 = vector.broadcast %cst_57 : f32 to vector<8x64xf32>
    %152 = arith.subf %151, %144 : vector<8x64xf32>
    %153 = arith.mulf %152, %150 : vector<8x64xf32>
    %154 = arith.mulf %144, %127 : vector<8x64xf32>
    %155 = arith.addf %153, %154 : vector<8x64xf32>
    %156 = arith.addf %128, %155 : vector<8x64xf32>
    %c32_58 = arith.constant 32 : index
    %c0_59 = arith.constant 0 : index
    %157 = vector.load %arg12[%c32_58, %c0_59] : memref<80x64xf32, #tpu.memory_space<vmem>>, vector<8x64xf32>
    tpu.vector_store %arg12[%c32_58, %c0_59], %156 {strides = array<i32>} : memref<80x64xf32, #tpu.memory_space<vmem>>, vector<8x64xf32>,
    %c40 = arith.constant 40 : index
    %c0_60 = arith.constant 0 : index
    %158 = vector.load %arg11[%c40, %c0_60] : memref<80x256xf32, #tpu.memory_space<vmem>>, vector<8x256xf32>
    %159 = arith.truncf %155 : vector<8x64xf32> to vector<8x64xbf16>
    %cst_61 = arith.constant dense<0.000000e+00> : vector<8x256xf32>
    %160 = tpu.matmul %159, %13, %cst_61 {dimension_numbers = #tpu.dot_dimension_numbers<[1], [0], [0], [1], [0, 0, 1, 1], [], []>} : vector<8x64xbf16>, vector<64x256xbf16>, vector<8x256xf32> -> vector<8x256xf32>
    %161 = vector.extract_strided_slice %158 {offsets = [0, 0], sizes = [8, 128], strides = [1, 1]} : vector<8x256xf32> to vector<8x128xf32>
    %162 = vector.extract_strided_slice %160 {offsets = [0, 0], sizes = [8, 128], strides = [1, 1]} : vector<8x256xf32> to vector<8x128xf32>
    %163 = arith.addf %161, %162 : vector<8x128xf32>
    %cst_62 = arith.constant 5.000000e-01 : f32
    %164 = vector.broadcast %cst_62 : f32 to vector<8x128xf32>
    %165 = arith.mulf %164, %163 : vector<8x128xf32>
    %166 = math.tanh %165 : vector<8x128xf32>
    %cst_63 = arith.constant 1.000000e+00 : f32
    %167 = vector.broadcast %cst_63 : f32 to vector<8x128xf32>
    %168 = arith.addf %166, %167 : vector<8x128xf32>
    %cst_64 = arith.constant 5.000000e-01 : f32
    %169 = vector.broadcast %cst_64 : f32 to vector<8x128xf32>
    %170 = arith.mulf %169, %168 : vector<8x128xf32>
    %171 = vector.extract_strided_slice %170 {offsets = [0, 0], sizes = [8, 64], strides = [1, 1]} : vector<8x128xf32> to vector<8x64xf32>
    %172 = vector.extract_strided_slice %170 {offsets = [0, 64], sizes = [8, 64], strides = [1, 1]} : vector<8x128xf32> to vector<8x64xf32>
    %173 = vector.extract_strided_slice %158 {offsets = [0, 128], sizes = [8, 64], strides = [1, 1]} : vector<8x256xf32> to vector<8x64xf32>
    %174 = vector.extract_strided_slice %160 {offsets = [0, 128], sizes = [8, 64], strides = [1, 1]} : vector<8x256xf32> to vector<8x64xf32>
    %175 = arith.addf %174, %16 : vector<8x64xf32>
    %176 = arith.mulf %171, %175 : vector<8x64xf32>
    %177 = arith.addf %173, %176 : vector<8x64xf32>
    %178 = math.tanh %177 : vector<8x64xf32>
    %cst_65 = arith.constant 1.000000e+00 : f32
    %179 = vector.broadcast %cst_65 : f32 to vector<8x64xf32>
    %180 = arith.subf %179, %172 : vector<8x64xf32>
    %181 = arith.mulf %180, %178 : vector<8x64xf32>
    %182 = arith.mulf %172, %155 : vector<8x64xf32>
    %183 = arith.addf %181, %182 : vector<8x64xf32>
    %184 = arith.addf %156, %183 : vector<8x64xf32>
    %c40_66 = arith.constant 40 : index
    %c0_67 = arith.constant 0 : index
    %185 = vector.load %arg12[%c40_66, %c0_67] : memref<80x64xf32, #tpu.memory_space<vmem>>, vector<8x64xf32>
    tpu.vector_store %arg12[%c40_66, %c0_67], %184 {strides = array<i32>} : memref<80x64xf32, #tpu.memory_space<vmem>>, vector<8x64xf32>,
    %c48 = arith.constant 48 : index
    %c0_68 = arith.constant 0 : index
    %186 = vector.load %arg11[%c48, %c0_68] : memref<80x256xf32, #tpu.memory_space<vmem>>, vector<8x256xf32>
    %187 = arith.truncf %183 : vector<8x64xf32> to vector<8x64xbf16>
    %cst_69 = arith.constant dense<0.000000e+00> : vector<8x256xf32>
    %188 = tpu.matmul %187, %13, %cst_69 {dimension_numbers = #tpu.dot_dimension_numbers<[1], [0], [0], [1], [0, 0, 1, 1], [], []>} : vector<8x64xbf16>, vector<64x256xbf16>, vector<8x256xf32> -> vector<8x256xf32>
    %189 = vector.extract_strided_slice %186 {offsets = [0, 0], sizes = [8, 128], strides = [1, 1]} : vector<8x256xf32> to vector<8x128xf32>
    %190 = vector.extract_strided_slice %188 {offsets = [0, 0], sizes = [8, 128], strides = [1, 1]} : vector<8x256xf32> to vector<8x128xf32>
    %191 = arith.addf %189, %190 : vector<8x128xf32>
    %cst_70 = arith.constant 5.000000e-01 : f32
    %192 = vector.broadcast %cst_70 : f32 to vector<8x128xf32>
    %193 = arith.mulf %192, %191 : vector<8x128xf32>
    %194 = math.tanh %193 : vector<8x128xf32>
    %cst_71 = arith.constant 1.000000e+00 : f32
    %195 = vector.broadcast %cst_71 : f32 to vector<8x128xf32>
    %196 = arith.addf %194, %195 : vector<8x128xf32>
    %cst_72 = arith.constant 5.000000e-01 : f32
    %197 = vector.broadcast %cst_72 : f32 to vector<8x128xf32>
    %198 = arith.mulf %197, %196 : vector<8x128xf32>
    %199 = vector.extract_strided_slice %198 {offsets = [0, 0], sizes = [8, 64], strides = [1, 1]} : vector<8x128xf32> to vector<8x64xf32>
    %200 = vector.extract_strided_slice %198 {offsets = [0, 64], sizes = [8, 64], strides = [1, 1]} : vector<8x128xf32> to vector<8x64xf32>
    %201 = vector.extract_strided_slice %186 {offsets = [0, 128], sizes = [8, 64], strides = [1, 1]} : vector<8x256xf32> to vector<8x64xf32>
    %202 = vector.extract_strided_slice %188 {offsets = [0, 128], sizes = [8, 64], strides = [1, 1]} : vector<8x256xf32> to vector<8x64xf32>
    %203 = arith.addf %202, %16 : vector<8x64xf32>
    %204 = arith.mulf %199, %203 : vector<8x64xf32>
    %205 = arith.addf %201, %204 : vector<8x64xf32>
    %206 = math.tanh %205 : vector<8x64xf32>
    %cst_73 = arith.constant 1.000000e+00 : f32
    %207 = vector.broadcast %cst_73 : f32 to vector<8x64xf32>
    %208 = arith.subf %207, %200 : vector<8x64xf32>
    %209 = arith.mulf %208, %206 : vector<8x64xf32>
    %210 = arith.mulf %200, %183 : vector<8x64xf32>
    %211 = arith.addf %209, %210 : vector<8x64xf32>
    %212 = arith.addf %184, %211 : vector<8x64xf32>
    %c48_74 = arith.constant 48 : index
    %c0_75 = arith.constant 0 : index
    %213 = vector.load %arg12[%c48_74, %c0_75] : memref<80x64xf32, #tpu.memory_space<vmem>>, vector<8x64xf32>
    tpu.vector_store %arg12[%c48_74, %c0_75], %212 {strides = array<i32>} : memref<80x64xf32, #tpu.memory_space<vmem>>, vector<8x64xf32>,
    %c56 = arith.constant 56 : index
    %c0_76 = arith.constant 0 : index
    %214 = vector.load %arg11[%c56, %c0_76] : memref<80x256xf32, #tpu.memory_space<vmem>>, vector<8x256xf32>
    %215 = arith.truncf %211 : vector<8x64xf32> to vector<8x64xbf16>
    %cst_77 = arith.constant dense<0.000000e+00> : vector<8x256xf32>
    %216 = tpu.matmul %215, %13, %cst_77 {dimension_numbers = #tpu.dot_dimension_numbers<[1], [0], [0], [1], [0, 0, 1, 1], [], []>} : vector<8x64xbf16>, vector<64x256xbf16>, vector<8x256xf32> -> vector<8x256xf32>
    %217 = vector.extract_strided_slice %214 {offsets = [0, 0], sizes = [8, 128], strides = [1, 1]} : vector<8x256xf32> to vector<8x128xf32>
    %218 = vector.extract_strided_slice %216 {offsets = [0, 0], sizes = [8, 128], strides = [1, 1]} : vector<8x256xf32> to vector<8x128xf32>
    %219 = arith.addf %217, %218 : vector<8x128xf32>
    %cst_78 = arith.constant 5.000000e-01 : f32
    %220 = vector.broadcast %cst_78 : f32 to vector<8x128xf32>
    %221 = arith.mulf %220, %219 : vector<8x128xf32>
    %222 = math.tanh %221 : vector<8x128xf32>
    %cst_79 = arith.constant 1.000000e+00 : f32
    %223 = vector.broadcast %cst_79 : f32 to vector<8x128xf32>
    %224 = arith.addf %222, %223 : vector<8x128xf32>
    %cst_80 = arith.constant 5.000000e-01 : f32
    %225 = vector.broadcast %cst_80 : f32 to vector<8x128xf32>
    %226 = arith.mulf %225, %224 : vector<8x128xf32>
    %227 = vector.extract_strided_slice %226 {offsets = [0, 0], sizes = [8, 64], strides = [1, 1]} : vector<8x128xf32> to vector<8x64xf32>
    %228 = vector.extract_strided_slice %226 {offsets = [0, 64], sizes = [8, 64], strides = [1, 1]} : vector<8x128xf32> to vector<8x64xf32>
    %229 = vector.extract_strided_slice %214 {offsets = [0, 128], sizes = [8, 64], strides = [1, 1]} : vector<8x256xf32> to vector<8x64xf32>
    %230 = vector.extract_strided_slice %216 {offsets = [0, 128], sizes = [8, 64], strides = [1, 1]} : vector<8x256xf32> to vector<8x64xf32>
    %231 = arith.addf %230, %16 : vector<8x64xf32>
    %232 = arith.mulf %227, %231 : vector<8x64xf32>
    %233 = arith.addf %229, %232 : vector<8x64xf32>
    %234 = math.tanh %233 : vector<8x64xf32>
    %cst_81 = arith.constant 1.000000e+00 : f32
    %235 = vector.broadcast %cst_81 : f32 to vector<8x64xf32>
    %236 = arith.subf %235, %228 : vector<8x64xf32>
    %237 = arith.mulf %236, %234 : vector<8x64xf32>
    %238 = arith.mulf %228, %211 : vector<8x64xf32>
    %239 = arith.addf %237, %238 : vector<8x64xf32>
    %240 = arith.addf %212, %239 : vector<8x64xf32>
    %c56_82 = arith.constant 56 : index
    %c0_83 = arith.constant 0 : index
    %241 = vector.load %arg12[%c56_82, %c0_83] : memref<80x64xf32, #tpu.memory_space<vmem>>, vector<8x64xf32>
    tpu.vector_store %arg12[%c56_82, %c0_83], %240 {strides = array<i32>} : memref<80x64xf32, #tpu.memory_space<vmem>>, vector<8x64xf32>,
    %c64 = arith.constant 64 : index
    %c0_84 = arith.constant 0 : index
    %242 = vector.load %arg11[%c64, %c0_84] : memref<80x256xf32, #tpu.memory_space<vmem>>, vector<8x256xf32>
    %243 = arith.truncf %239 : vector<8x64xf32> to vector<8x64xbf16>
    %cst_85 = arith.constant dense<0.000000e+00> : vector<8x256xf32>
    %244 = tpu.matmul %243, %13, %cst_85 {dimension_numbers = #tpu.dot_dimension_numbers<[1], [0], [0], [1], [0, 0, 1, 1], [], []>} : vector<8x64xbf16>, vector<64x256xbf16>, vector<8x256xf32> -> vector<8x256xf32>
    %245 = vector.extract_strided_slice %242 {offsets = [0, 0], sizes = [8, 128], strides = [1, 1]} : vector<8x256xf32> to vector<8x128xf32>
    %246 = vector.extract_strided_slice %244 {offsets = [0, 0], sizes = [8, 128], strides = [1, 1]} : vector<8x256xf32> to vector<8x128xf32>
    %247 = arith.addf %245, %246 : vector<8x128xf32>
    %cst_86 = arith.constant 5.000000e-01 : f32
    %248 = vector.broadcast %cst_86 : f32 to vector<8x128xf32>
    %249 = arith.mulf %248, %247 : vector<8x128xf32>
    %250 = math.tanh %249 : vector<8x128xf32>
    %cst_87 = arith.constant 1.000000e+00 : f32
    %251 = vector.broadcast %cst_87 : f32 to vector<8x128xf32>
    %252 = arith.addf %250, %251 : vector<8x128xf32>
    %cst_88 = arith.constant 5.000000e-01 : f32
    %253 = vector.broadcast %cst_88 : f32 to vector<8x128xf32>
    %254 = arith.mulf %253, %252 : vector<8x128xf32>
    %255 = vector.extract_strided_slice %254 {offsets = [0, 0], sizes = [8, 64], strides = [1, 1]} : vector<8x128xf32> to vector<8x64xf32>
    %256 = vector.extract_strided_slice %254 {offsets = [0, 64], sizes = [8, 64], strides = [1, 1]} : vector<8x128xf32> to vector<8x64xf32>
    %257 = vector.extract_strided_slice %242 {offsets = [0, 128], sizes = [8, 64], strides = [1, 1]} : vector<8x256xf32> to vector<8x64xf32>
    %258 = vector.extract_strided_slice %244 {offsets = [0, 128], sizes = [8, 64], strides = [1, 1]} : vector<8x256xf32> to vector<8x64xf32>
    %259 = arith.addf %258, %16 : vector<8x64xf32>
    %260 = arith.mulf %255, %259 : vector<8x64xf32>
    %261 = arith.addf %257, %260 : vector<8x64xf32>
    %262 = math.tanh %261 : vector<8x64xf32>
    %cst_89 = arith.constant 1.000000e+00 : f32
    %263 = vector.broadcast %cst_89 : f32 to vector<8x64xf32>
    %264 = arith.subf %263, %256 : vector<8x64xf32>
    %265 = arith.mulf %264, %262 : vector<8x64xf32>
    %266 = arith.mulf %256, %239 : vector<8x64xf32>
    %267 = arith.addf %265, %266 : vector<8x64xf32>
    %268 = arith.addf %240, %267 : vector<8x64xf32>
    %c64_90 = arith.constant 64 : index
    %c0_91 = arith.constant 0 : index
    %269 = vector.load %arg12[%c64_90, %c0_91] : memref<80x64xf32, #tpu.memory_space<vmem>>, vector<8x64xf32>
    tpu.vector_store %arg12[%c64_90, %c0_91], %268 {strides = array<i32>} : memref<80x64xf32, #tpu.memory_space<vmem>>, vector<8x64xf32>,
    %c72 = arith.constant 72 : index
    %c0_92 = arith.constant 0 : index
    %270 = vector.load %arg11[%c72, %c0_92] : memref<80x256xf32, #tpu.memory_space<vmem>>, vector<8x256xf32>
    %271 = arith.truncf %267 : vector<8x64xf32> to vector<8x64xbf16>
    %cst_93 = arith.constant dense<0.000000e+00> : vector<8x256xf32>
    %272 = tpu.matmul %271, %13, %cst_93 {dimension_numbers = #tpu.dot_dimension_numbers<[1], [0], [0], [1], [0, 0, 1, 1], [], []>} : vector<8x64xbf16>, vector<64x256xbf16>, vector<8x256xf32> -> vector<8x256xf32>
    %273 = vector.extract_strided_slice %270 {offsets = [0, 0], sizes = [8, 128], strides = [1, 1]} : vector<8x256xf32> to vector<8x128xf32>
    %274 = vector.extract_strided_slice %272 {offsets = [0, 0], sizes = [8, 128], strides = [1, 1]} : vector<8x256xf32> to vector<8x128xf32>
    %275 = arith.addf %273, %274 : vector<8x128xf32>
    %cst_94 = arith.constant 5.000000e-01 : f32
    %276 = vector.broadcast %cst_94 : f32 to vector<8x128xf32>
    %277 = arith.mulf %276, %275 : vector<8x128xf32>
    %278 = math.tanh %277 : vector<8x128xf32>
    %cst_95 = arith.constant 1.000000e+00 : f32
    %279 = vector.broadcast %cst_95 : f32 to vector<8x128xf32>
    %280 = arith.addf %278, %279 : vector<8x128xf32>
    %cst_96 = arith.constant 5.000000e-01 : f32
    %281 = vector.broadcast %cst_96 : f32 to vector<8x128xf32>
    %282 = arith.mulf %281, %280 : vector<8x128xf32>
    %283 = vector.extract_strided_slice %282 {offsets = [0, 0], sizes = [8, 64], strides = [1, 1]} : vector<8x128xf32> to vector<8x64xf32>
    %284 = vector.extract_strided_slice %282 {offsets = [0, 64], sizes = [8, 64], strides = [1, 1]} : vector<8x128xf32> to vector<8x64xf32>
    %285 = vector.extract_strided_slice %270 {offsets = [0, 128], sizes = [8, 64], strides = [1, 1]} : vector<8x256xf32> to vector<8x64xf32>
    %286 = vector.extract_strided_slice %272 {offsets = [0, 128], sizes = [8, 64], strides = [1, 1]} : vector<8x256xf32> to vector<8x64xf32>
    %287 = arith.addf %286, %16 : vector<8x64xf32>
    %288 = arith.mulf %283, %287 : vector<8x64xf32>
    %289 = arith.addf %285, %288 : vector<8x64xf32>
    %290 = math.tanh %289 : vector<8x64xf32>
    %cst_97 = arith.constant 1.000000e+00 : f32
    %291 = vector.broadcast %cst_97 : f32 to vector<8x64xf32>
    %292 = arith.subf %291, %284 : vector<8x64xf32>
    %293 = arith.mulf %292, %290 : vector<8x64xf32>
    %294 = arith.mulf %284, %267 : vector<8x64xf32>
    %295 = arith.addf %293, %294 : vector<8x64xf32>
    %296 = arith.addf %268, %295 : vector<8x64xf32>
    %c72_98 = arith.constant 72 : index
    %c0_99 = arith.constant 0 : index
    %297 = vector.load %arg12[%c72_98, %c0_99] : memref<80x64xf32, #tpu.memory_space<vmem>>, vector<8x64xf32>
    tpu.vector_store %arg12[%c72_98, %c0_99], %296 {strides = array<i32>} : memref<80x64xf32, #tpu.memory_space<vmem>>, vector<8x64xf32>,
    %c0_100 = arith.constant 0 : index
    %c0_101 = arith.constant 0 : index
    %298 = vector.load %arg12[%c0_100, %c0_101] : memref<80x64xf32, #tpu.memory_space<vmem>>, vector<80x64xf32>
    %c0_102 = arith.constant 0 : index
    %c0_103 = arith.constant 0 : index
    %299 = vector.load %arg8[%c0_102, %c0_103] : memref<64x2xf32, #tpu.memory_space<vmem>>, vector<64x2xf32>
    %cst_104 = arith.constant dense<0.000000e+00> : vector<80x2xf32>
    %300 = tpu.matmul %298, %299, %cst_104 {dimension_numbers = #tpu.dot_dimension_numbers<[1], [0], [0], [1], [0, 0, 1, 1], [], []>} : vector<80x64xf32>, vector<64x2xf32>, vector<80x2xf32> -> vector<80x2xf32>
    %c0_105 = arith.constant 0 : index
    %c0_106 = arith.constant 0 : index
    %301 = vector.load %arg9[%c0_105, %c0_106] : memref<80x2xf32, #tpu.memory_space<vmem>>, vector<80x2xf32>
    %302 = arith.addf %300, %301 : vector<80x2xf32>
    %c0_107 = arith.constant 0 : index
    %c0_108 = arith.constant 0 : index
    %303 = vector.load %arg10[%c0_107, %c0_108] : memref<80x2xf32, #tpu.memory_space<vmem>>, vector<80x2xf32>
    tpu.vector_store %arg10[%c0_107, %c0_108], %302 {strides = array<i32>} : memref<80x2xf32, #tpu.memory_space<vmem>>, vector<80x2xf32>,
    return
  }
}

</mosaic_0001>

<bundles_post_ra>
// kernel: gru_waypoints_forward.1
= control target key start
LH: loop header
LB: loop body
LE: loop exit
PB: predicated region body
PF: predicated region fallthrough
CT: control target
= control target key end

     0   :  { %vm49_vm0 = vcmask 1041408   ;;  %vm45_vm1 = vcmask 15360   ;;  %v1485_v0 = vmov 0.0   ;;  %vm1486_vm2 = vmmov 0   ;;  %s2064_s2 = inlined_call_operand.vmem [shape: f32[2,64], index: 2, kind: input, shape index: {}]   ;;  %s2065_s1 = inlined_call_operand.vmem [shape: f32[8,2], index: 1, kind: input, shape index: {}]   ;;  %s2066_s4 = inlined_call_operand.vmem [shape: f32[32,256], index: 4, kind: input, shape index: {}]   ;;  %s2067_s5 = inlined_call_operand.vmem [shape: bf16[64,256], index: 5, kind: input, shape index: {}]   ;;  %s2068_s0 = inlined_call_operand.vmem [shape: f32[80,32], index: 0, kind: input, shape index: {}]   ;;  %s2069_s3 = inlined_call_operand.vmem [shape: f32[1,64], index: 3, kind: input, shape index: {}]   ;;  %s2070_s6 = inlined_call_operand.vmem [shape: f32[1,256], index: 6, kind: input, shape index: {}]   ;;  %s2071_s7 = inlined_call_operand.vmem [shape: f32[1,64], index: 7, kind: input, shape index: {}]   ;;  %s2072_s8 = inlined_call_operand.vmem [shape: f32[64,2], index: 8, kind: input, shape index: {}]   ;;  %s2073_s9 = inlined_call_operand.vmem [shape: f32[80,2], index: 9, kind: input, shape index: {}]   ;;  %s2074_s10 = inlined_call_operand.vmem [shape: f32[80,2], index: 10, kind: output, shape index: {}]  }
   0x1   :  { %1365 = vmatprep.subr.mxu0 %v1485_v0  ;;  %v37_v1 = vld [vmem:[%s2064_s2] sm:$0x3]  ;;  %1367 = vmatprep.mubr.msk.f32.mxu0 %vm1486_vm2, %v1485_v0  ;;  %v134_v3 = vld [vmem:[%s2066_s4 + $0x8] sm:$0xff]  ;;  %v136_v4 = vld [vmem:[%s2066_s4 + $0x18] sm:$0xff]  ;;  %vm153_vm3 = vcmask 261120   ;;  %v1487_v27 = vmov 0   ;;  %v143_v41 = vlaneseq }
   0x2   :  { %v36_v2 = vld [vmem:[%s2065_s1] sm:$0xff]  ;;  %1366 = vmatpush3.msk.msra.mxu0 %vm49_vm0, %v37_v1  ;;  %v135_v6 = vld [vmem:[%s2066_s4 + $0x10] sm:$0xff]  ;;  %272 = vmatprep.mubr.f32.mxu1 %v1485_v0  ;;  %v1401_v7 = vpack.c.bf16 %v136_v4, %v134_v3  ;;  %v138_v9 = vld [vmem:[%s2066_s4 + $0x28] sm:$0xff]  ;;  %vm387_vm4 = vcmask 523264  }
   0x3   :  { %v133_v5 = vld [vmem:[%s2066_s4] sm:$0xff]  ;;  %1368 = vmatmul.mubr.msk.f32.vlgmr.msra.gmra.mrb[0].mxu0 %vm45_vm1, %v36_v2  ;;  %v140_v10 = vld [vmem:[%s2066_s4 + $0x38] sm:$0xff]  ;;  %v139_v13 = vld [vmem:[%s2066_s4 + $0x30] sm:$0xff]  ;;  %v144_v42 = vshrl.u32 %v143_v41, 7 }
   0x4   :  { %v1403_v8 = vpack.c.bf16 %v135_v6, %v133_v5  ;;  %v137_v11 = vld [vmem:[%s2066_s4 + $0x20] sm:$0xff]  ;;  %v1405_v12 = vpack.c.bf16 %v140_v10, %v138_v9  ;;  %248 = vmatprep.mubr.f32.mxu0 %v1485_v0  ;;  %1402 = vmatprep.subr.bf16.mxu0 %v1401_v7  ;;  %v1596_v18 = vld [vmem:[%s2067_s5 + $0x14] ss:$8 sps:$4 sm:$0xff]   ;;  %v124_v19 = vld [vmem:[%s2068_s0 + $0x8] sm:$0xff] }
   0x5   :  { %1425 = vmatprep.subr.bf16.mxu1 %v1401_v7  ;;  %v1407_v14 = vpack.c.bf16 %v139_v13, %v137_v11  ;;  %v1582_v15 = vld [vmem:[%s2067_s5 + $0x4] ss:$8 sps:$4 sm:$0xff]   ;;  %v1590_v17 = vld [vmem:[%s2067_s5] ss:$8 sps:$4 sm:$0xff]   ;;  %v1608_v20 = vld [vmem:[%s2067_s5 + $0x10] ss:$8 sps:$4 sm:$0xff]  }
   0x6   :  { %1404 = vmatpush1.bf16.msra.mxu0 %v1403_v8  ;;  %1427 = vmatpush1.bf16.msra.mxu1 %v1403_v8  ;;  %v123_v16 = vld [vmem:[%s2068_s0] sm:$0xff]  ;;  %v125_v22 = vld [vmem:[%s2068_s0 + $0x10] sm:$0xff]  ;;  %v126_v24 = vld [vmem:[%s2068_s0 + $0x18] sm:$0xff]  ;;  %v145_v43 = vsub.s32 0, %v144_v42  ;;  %v149_v53 = vsub.s32 1, %v144_v42 }
   0x7   :  { %1406 = vmatprep.subr.bf16.mxu0 %v1405_v12  ;;  %1426 = vmatprep.subr.bf16.mxu1 %v1405_v12  ;;  %v1614_v21 = vld [vmem:[%s2067_s5 + $0x24] ss:$8 sps:$4 sm:$0xff]   ;;  %v1625_v23 = vld [vmem:[%s2067_s5 + $0x20] ss:$8 sps:$4 sm:$0xff]   ;;  %v1637_v25 = vld [vmem:[%s2067_s5 + $0x34] ss:$8 sps:$4 sm:$0xff]  }
   0x8   :  { %v1643_v26 = vld [vmem:[%s2067_s5 + $0x30] ss:$8 sps:$4 sm:$0xff]   ;;  %v1303_v28 = vld [vmem:[%s2069_s3] ss:$0 sm:$0xff]  ;;  %v132_v42 = vld [vmem:[%s2068_s0 + $0x48] sm:$0xff] }
   0x9   :  { %v141_v44 = vld [vmem:[%s2070_s6] sm:$0x3]  ;;  %s1488_s6 = smov 64  }
   0xa   :  { %1408 = vmatpush1.bf16.msra.mxu0 %v1407_v14  ;;  %1428 = vmatpush1.bf16.msra.mxu1 %v1407_v14  ;;  %v1675_v45 = vrot.slane %v141_v44, %v145_v43  ;;  %v1681_v55 = vld [vmem:[%s2071_s7] ss:$0 sm:$0xff]  ;;  %v1683_v56 = vrot.slane %v141_v44, %v149_v53 }
   0xb   :  { %391 = vmatprep.subr.bf16.mxu0 %v1582_v15  ;;  %541 = vmatprep.subr.bf16.mxu1 %v1582_v15  ;;  %v131_v41 = vld [vmem:[%s2068_s0 + $0x40] sm:$0xff] }
   0xd   :  { %1306 = vmatmul.mubr.msk.f32.vlgmr.msra.gmra.mrb[2].mxu0 %vm153_vm3, %v123_v16 }
   0xe   :  { %392 = vmatpush1.bf16.msra.mxu0 %v1590_v17  ;;  %254 = vmatprep.mubr.f32.mxu0 %v1485_v0 }
   0xf   :  { %393 = vmatprep.subr.bf16.mxu0 %v1596_v18 }
  0x11   :  { %1307 = vmatmul.mubr.msk.f32.gmra.mrb[4].mxu0 %vm153_vm3, %v124_v19 }
  0x12   :  { %394 = vmatpush1.bf16.msra.mxu0 %v1608_v20  ;;  %260 = vmatprep.mubr.f32.mxu0 %v1485_v0 }
  0x13   :  { %395 = vmatprep.subr.bf16.mxu0 %v1614_v21 }
  0x15   :  { %1308 = vmatmul.mubr.msk.f32.gmra.mrb[6].mxu0 %vm153_vm3, %v125_v22 }
  0x16   :  { %396 = vmatpush1.bf16.msra.mxu0 %v1625_v23  ;;  %266 = vmatprep.mubr.f32.mxu0 %v1485_v0 }
  0x17   :  { %397 = vmatprep.subr.bf16.mxu0 %v1637_v25 }
  0x19   :  { %1309 = vmatmul.mubr.msk.f32.gmra.mrb[8].mxu0 %vm153_vm3, %v126_v24 }
  0x1a   :  { %398 = vmatpush1.bf16.msra.mxu0 %v1643_v26  ;;  %423 = vmatprep.mubr.bf16.mxu0 %v1487_v27 }
  0x1b   :  { %468 = vmatprep.subr.bf16.mxu0 %v1582_v15 }
  0xd6   :  { %v119_v29 = vpop.f32.mrb[0].mxu0 }
  0xd7   :  { %v120_v30 = vadd.f32 %v1303_v28, %v119_v29  ;;  %v1369_v31 = vpop.f32.mrb[1].mxu0 }
  0xd9   :  { %v346_v32 = vpack.c.bf16 %v120_v30, %v120_v30 }
  0xdb   :  { %1325 = vmatmul.mubr.msk.bf16.vlgmr.msra.gmra.mrb[12].mxu0 %vm387_vm4, %v346_v32  ;;  %v127_v32 = vld [vmem:[%s2068_s0 + $0x20] sm:$0xff] }
  0xdc   :  { %469 = vmatpush1.bf16.msra.mxu0 %v1590_v17  ;;  %500 = vmatprep.mubr.bf16.mxu0 %v1487_v27 }
  0xdd   :  { %470 = vmatprep.subr.bf16.mxu0 %v1596_v18  ;;  %1310 = vmatmul.mubr.msk.f32.vlgmr.msra.gmra.mrb[0].mxu1 %vm153_vm3, %v127_v32 }
  0xde   :  { %542 = vmatpush1.bf16.msra.mxu1 %v1590_v17  ;;  %278 = vmatprep.mubr.f32.mxu1 %v1485_v0 }
  0xdf   :  { %543 = vmatprep.subr.bf16.mxu1 %v1596_v18 }
  0xe0   :  { %v250_v33 = vpop.f32.mrb[2].mxu0  ;;  %471 = vmatpush1.bf16.msra.mxu0 %v1608_v20 }
  0xe1   :  { %v252_v34 = vpop.f32.mrb[3].mxu0  ;;  %472 = vmatprep.subr.bf16.mxu0 %v1614_v21  ;;  %v251_v46 = vadd.f32 %v250_v33, %v1675_v45  ;;  %v128_v33 = vld [vmem:[%s2068_s0 + $0x28] sm:$0xff] }
  0xe2   :  { %v253_v60 = vadd.f32 %v252_v34, %v1683_v56  ;;  %1311 = vmatmul.mubr.msk.f32.gmra.mrb[2].mxu1 %vm153_vm3, %v128_v33 }
  0xe3   :  { %284 = vmatprep.mubr.f32.mxu1 %v1485_v0  ;;  %544 = vmatpush1.bf16.msra.mxu1 %v1608_v20 }
  0xe4   :  { %v256_v35 = vpop.f32.mrb[4].mxu0  ;;  %473 = vmatpush1.bf16.msra.mxu0 %v1625_v23  ;;  %545 = vmatprep.subr.bf16.mxu1 %v1614_v21 }
  0xe5   :  { %v1659_v36 = vpop.f32.mrb[5].mxu0  ;;  %474 = vmatprep.subr.bf16.mxu0 %v1637_v25  ;;  %v257_v9 = vadd.f32 %v256_v35, %v1675_v45  ;;  %v129_v35 = vld [vmem:[%s2068_s0 + $0x30] sm:$0xff] }
  0xe6   :  { %v259_v29 = vadd.f32 %v1659_v36, %v1683_v56  ;;  %1312 = vmatmul.mubr.msk.f32.gmra.mrb[4].mxu1 %vm153_vm3, %v129_v35  ;;  %v130_v36 = vld [vmem:[%s2068_s0 + $0x38] sm:$0xff] }
  0xe7   :  { %290 = vmatprep.mubr.f32.mxu1 %v1485_v0  ;;  %546 = vmatpush1.bf16.msra.mxu1 %v1625_v23 }
  0xe8   :  { %v1662_v37 = vpop.f32.mrb[6].mxu0  ;;  %475 = vmatpush1.bf16.msra.mxu0 %v1643_v26  ;;  %547 = vmatprep.subr.bf16.mxu1 %v1637_v25 }
  0xe9   :  { %v1665_v38 = vpop.f32.mrb[7].mxu0  ;;  %614 = vmatprep.subr.bf16.mxu0 %v1582_v15 }
  0xea   :  { %1313 = vmatmul.mubr.msk.f32.gmra.mrb[6].mxu1 %vm153_vm3, %v130_v36 }
  0xeb   :  { %296 = vmatprep.mubr.f32.mxu1 %v1485_v0  ;;  %548 = vmatpush1.bf16.msra.mxu1 %v1643_v26 }
  0xec   :  { %v1668_v39 = vpop.f32.mrb[8].mxu0  ;;  %687 = vmatprep.subr.bf16.mxu1 %v1582_v15 }
  0xed   :  { %v1670_v40 = vpop.f32.mrb[9].mxu0 }
  0xee   :  { %1314 = vmatmul.mubr.msk.f32.gmra.mrb[8].mxu1 %vm153_vm3, %v131_v41 }
  0xef   :  { %302 = vmatprep.mubr.f32.mxu1 %v1485_v0 }
  0xf2   :  { %1315 = vmatmul.mubr.msk.f32.gmra.mrb[10].mxu1 %vm153_vm3, %v132_v42 }
  0xf3   :  { %573 = vmatprep.mubr.bf16.mxu1 %v1487_v27 }
 0x1ae   :  { %v425_v47 = vpop.f32.mrb[12].mxu0 }
 0x1af   :  { %v432_v48 = vadd.f32 %v425_v47, %v251_v46  ;;  %v427_v49 = vpop.f32.mrb[13].mxu0 }
 0x1b0   :  { %v429_v50 = vpop.f32.mrb[14].mxu0  ;;  %v437_v59 = vadd.f32 %v1681_v55, %v427_v49  ;;  %v1753_v0 = vpop.f32.mrb[0].mxu1 }
 0x1b1   :  { %v433_v51 = vmul.f32 0.5, %v432_v48  ;;  %v430_v52 = vpop.f32.mrb[15].mxu0  ;;  %v1755_v50 = vpop.f32.mrb[1].mxu1 }
 0x1b3   :  { %1445 = vtanh.f32 %v433_v51 }
 0x1b5   :  { %v1757_v51 = vpop.f32.mrb[2].mxu1 }
 0x1b6   :  { %v1759_v52 = vpop.f32.mrb[3].mxu1 }
 0x1b9   :  { %v1761_v53 = vpop.f32.mrb[4].mxu1 }
 0x1bd   :  { %v1446_v54 = vpop.eup %1445 }
 0x1be   :  { %v435_v57 = vadd.f32 1.0, %v1446_v54  ;;  %v1763_v54 = vpop.f32.mrb[5].mxu1 }
 0x1c0   :  { %v436_v58 = vmul.f32 0.5, %v435_v57  ;;  %v1765_v57 = vpop.f32.mrb[6].mxu1 }
 0x1c2   :  { %v438_v61 = vmul.f32 %v437_v59, %v436_v58  ;;  %v441_v2 = vsub.f32 1.0, %v436_v58 }
 0x1c4   :  { %v439_v62 = vadd.f32 %v438_v61, %v253_v60 }
 0x1c6   :  { %1447 = vtanh.f32 %v439_v62 }
 0x1d0   :  { %v1448_v63 = vpop.eup %1447 }
 0x1d1   :  { %443 = vrot.lane.b32.xlu0 %v1448_v63, %s1488_s6 }
 0x1d5   :  { %448 = vrot.lane.b32.xlu0 %v120_v30, %s1488_s6 }
 0x243   :  { %v444_v1 = vpop.permute.xlu0 %443 }
 0x244   :  { %v446_v4 = vmul.f32 %v444_v1, %v441_v2  ;;  %v263_v1 = vadd.f32 %v1662_v37, %v1675_v45 }
 0x247   :  { %v449_v3 = vpop.permute.xlu0 %448 }
 0x248   :  { %v451_v5 = vmul.f32 %v449_v3, %v436_v58  ;;  %v1767_v58 = vpop.f32.mrb[7].mxu1 }
 0x249   :  { %v1769_v59 = vpop.f32.mrb[8].mxu1 }
 0x24a   :  { %v1689_v6 = vadd.f32 %v451_v5, %v446_v4  ;;  %v1771_v60 = vpop.f32.mrb[9].mxu1 }
 0x24b   :  { %v1773_v61 = vpop.f32.mrb[10].mxu1 }
 0x24c   :  { %v461_v7 = vpack.c.bf16 %v1689_v6, %v1689_v6  ;;  %v1775_v62 = vpop.f32.mrb[11].mxu1 }
 0x24e   :  { %463 = vrot.lane.b32.xlu1 %v461_v7, %s1488_s6 }
 0x2c0   :  { %v464_v8 = vpop.permute.xlu1 %463 }
 0x2c1   :  { %1326 = vmatmul.mubr.msk.bf16.vlgmr.msra.gmra.mrb[16].mxu0 %vm387_vm4, %v464_v8 }
 0x2c2   :  { %615 = vmatpush1.bf16.msra.mxu0 %v1590_v17  ;;  %646 = vmatprep.mubr.bf16.mxu0 %v1487_v27 }
 0x2c3   :  { %616 = vmatprep.subr.bf16.mxu0 %v1596_v18 }
 0x2c6   :  { %617 = vmatpush1.bf16.msra.mxu0 %v1608_v20 }
 0x2c7   :  { %618 = vmatprep.subr.bf16.mxu0 %v1614_v21 }
 0x2ca   :  { %619 = vmatpush1.bf16.msra.mxu0 %v1625_v23 }
 0x2cb   :  { %620 = vmatprep.subr.bf16.mxu0 %v1637_v25 }
 0x2ce   :  { %621 = vmatpush1.bf16.msra.mxu0 %v1643_v26 }
 0x2cf   :  { %760 = vmatprep.subr.bf16.mxu0 %v1582_v15 }
 0x394   :  { %v502_v10 = vpop.f32.mrb[16].mxu0 }
 0x395   :  { %v509_v11 = vadd.f32 %v502_v10, %v257_v9  ;;  %v504_v12 = vpop.f32.mrb[17].mxu0 }
 0x396   :  { %v506_v13 = vpop.f32.mrb[18].mxu0  ;;  %v514_v28 = vadd.f32 %v1681_v55, %v504_v12 }
 0x397   :  { %v510_v14 = vmul.f32 0.5, %v509_v11  ;;  %v507_v16 = vpop.f32.mrb[19].mxu0  ;;  %v265_v13 = vadd.f32 %v1665_v38, %v1683_v56  ;;  %v269_v38 = vadd.f32 %v1668_v39, %v1675_v45 }
 0x399   :  { %1449 = vtanh.f32 %v510_v14 }
 0x3a3   :  { %v1450_v19 = vpop.eup %1449 }
 0x3a4   :  { %v512_v22 = vadd.f32 1.0, %v1450_v19 }
 0x3a6   :  { %v513_v24 = vmul.f32 0.5, %v512_v22 }
 0x3a8   :  { %v515_v30 = vmul.f32 %v514_v28, %v513_v24  ;;  %v518_v43 = vsub.f32 1.0, %v513_v24  ;;  %v524_v46 = vmul.f32 %v513_v24, %v1689_v6 }
 0x3aa   :  { %v516_v31 = vadd.f32 %v515_v30, %v259_v29 }
 0x3ac   :  { %1451 = vtanh.f32 %v516_v31 }
 0x3b6   :  { %v1452_v34 = vpop.eup %1451 }
 0x3b7   :  { %520 = vrot.lane.b32.xlu1 %v1452_v34, %s1488_s6 }
 0x429   :  { %v521_v44 = vpop.permute.xlu1 %520 }
 0x42a   :  { %v523_v47 = vmul.f32 %v521_v44, %v518_v43 }
 0x42c   :  { %v1748_v48 = vadd.f32 %v524_v46, %v523_v47  ;;  %v271_v47 = vadd.f32 %v1670_v40, %v1683_v56  ;;  %v275_v40 = vadd.f32 %v1753_v0, %v1675_v45 }
 0x42e   :  { %v534_v49 = vpack.c.bf16 %v1748_v48, %v1748_v48 }
 0x430   :  { %536 = vrot.lane.b32.xlu0 %v534_v49, %s1488_s6 }
 0x4a2   :  { %v537_v63 = vpop.permute.xlu0 %536 }
 0x4a3   :  { %1327 = vmatmul.mubr.msk.bf16.vlgmr.msra.gmra.mrb[12].mxu1 %vm387_vm4, %v537_v63 }
 0x4a4   :  { %688 = vmatpush1.bf16.msra.mxu1 %v1590_v17  ;;  %719 = vmatprep.mubr.bf16.mxu1 %v1487_v27 }
 0x4a5   :  { %689 = vmatprep.subr.bf16.mxu1 %v1596_v18 }
 0x4a8   :  { %690 = vmatpush1.bf16.msra.mxu1 %v1608_v20 }
 0x4a9   :  { %691 = vmatprep.subr.bf16.mxu1 %v1614_v21 }
 0x4ac   :  { %692 = vmatpush1.bf16.msra.mxu1 %v1625_v23 }
 0x4ad   :  { %693 = vmatprep.subr.bf16.mxu1 %v1637_v25 }
 0x4b0   :  { %694 = vmatpush1.bf16.msra.mxu1 %v1643_v26 }
 0x4b1   :  { %833 = vmatprep.subr.bf16.mxu1 %v1582_v15 }
 0x576   :  { %v575_v2 = vpop.f32.mrb[12].mxu1 }
 0x577   :  { %v582_v3 = vadd.f32 %v575_v2, %v263_v1  ;;  %v577_v4 = vpop.f32.mrb[13].mxu1 }
 0x578   :  { %v579_v5 = vpop.f32.mrb[14].mxu1  ;;  %v587_v12 = vadd.f32 %v1681_v55, %v577_v4 }
 0x579   :  { %v583_v7 = vmul.f32 0.5, %v582_v3  ;;  %v580_v8 = vpop.f32.mrb[15].mxu1 }
 0x57b   :  { %1453 = vtanh.f32 %v583_v7 }
 0x585   :  { %v1454_v9 = vpop.eup %1453 }
 0x586   :  { %v585_v10 = vadd.f32 1.0, %v1454_v9 }
 0x588   :  { %v586_v11 = vmul.f32 0.5, %v585_v10 }
 0x58a   :  { %v588_v14 = vmul.f32 %v587_v12, %v586_v11  ;;  %v591_v37 = vsub.f32 1.0, %v586_v11  ;;  %v597_v24 = vmul.f32 %v586_v11, %v1748_v48 }
 0x58c   :  { %v589_v16 = vadd.f32 %v588_v14, %v265_v13 }
 0x58e   :  { %1455 = vtanh.f32 %v589_v16 }
 0x598   :  { %v1456_v19 = vpop.eup %1455 }
 0x599   :  { %593 = vrot.lane.b32.xlu1 %v1456_v19, %s1488_s6 }
 0x60b   :  { %v594_v22 = vpop.permute.xlu1 %593 }
 0x60c   :  { %v596_v28 = vmul.f32 %v594_v22, %v591_v37 }
 0x60e   :  { %v1794_v29 = vadd.f32 %v597_v24, %v596_v28  ;;  %v277_v24 = vadd.f32 %v1755_v50, %v1683_v56  ;;  %v281_v50 = vadd.f32 %v1757_v51, %v1675_v45 }
 0x610   :  { %v607_v30 = vpack.c.bf16 %v1794_v29, %v1794_v29 }
 0x612   :  { %609 = vrot.lane.b32.xlu0 %v607_v30, %s1488_s6 }
 0x684   :  { %v610_v31 = vpop.permute.xlu0 %609 }
 0x685   :  { %1328 = vmatmul.mubr.msk.bf16.vlgmr.msra.gmra.mrb[20].mxu0 %vm387_vm4, %v610_v31 }
 0x686   :  { %761 = vmatpush1.bf16.msra.mxu0 %v1590_v17  ;;  %792 = vmatprep.mubr.bf16.mxu0 %v1487_v27 }
 0x687   :  { %762 = vmatprep.subr.bf16.mxu0 %v1596_v18 }
 0x68a   :  { %763 = vmatpush1.bf16.msra.mxu0 %v1608_v20 }
 0x68b   :  { %764 = vmatprep.subr.bf16.mxu0 %v1614_v21 }
 0x68e   :  { %765 = vmatpush1.bf16.msra.mxu0 %v1625_v23 }
 0x68f   :  { %766 = vmatprep.subr.bf16.mxu0 %v1637_v25 }
 0x692   :  { %767 = vmatpush1.bf16.msra.mxu0 %v1643_v26 }
 0x693   :  { %906 = vmatprep.subr.bf16.mxu0 %v1582_v15 }
 0x758   :  { %v648_v32 = vpop.f32.mrb[20].mxu0 }
 0x759   :  { %v655_v33 = vadd.f32 %v648_v32, %v269_v38  ;;  %v650_v34 = vpop.f32.mrb[21].mxu0 }
 0x75a   :  { %v652_v35 = vpop.f32.mrb[22].mxu0  ;;  %v660_v46 = vadd.f32 %v1681_v55, %v650_v34 }
 0x75b   :  { %v656_v36 = vmul.f32 0.5, %v655_v33  ;;  %v653_v41 = vpop.f32.mrb[23].mxu0 }
 0x75d   :  { %1457 = vtanh.f32 %v656_v36 }
 0x767   :  { %v1458_v42 = vpop.eup %1457 }
 0x768   :  { %v658_v43 = vadd.f32 1.0, %v1458_v42 }
 0x76a   :  { %v659_v44 = vmul.f32 0.5, %v658_v43 }
 0x76c   :  { %v661_v49 = vmul.f32 %v660_v46, %v659_v44  ;;  %v664_v39 = vsub.f32 1.0, %v659_v44  ;;  %v670_v3 = vmul.f32 %v659_v44, %v1794_v29 }
 0x76e   :  { %v662_v63 = vadd.f32 %v661_v49, %v271_v47 }
 0x770   :  { %1459 = vtanh.f32 %v662_v63 }
 0x77a   :  { %v1460_v1 = vpop.eup %1459 }
 0x77b   :  { %666 = vrot.lane.b32.xlu1 %v1460_v1, %s1488_s6 }
 0x7ed   :  { %v667_v2 = vpop.permute.xlu1 %666 }
 0x7ee   :  { %v669_v4 = vmul.f32 %v667_v2, %v664_v39  ;;  %v283_v2 = vadd.f32 %v1759_v52, %v1683_v56  ;;  %v287_v52 = vadd.f32 %v1761_v53, %v1675_v45 }
 0x7f0   :  { %v1816_v5 = vadd.f32 %v670_v3, %v669_v4 }
 0x7f2   :  { %v680_v7 = vpack.c.bf16 %v1816_v5, %v1816_v5 }
 0x7f4   :  { %682 = vrot.lane.b32.xlu0 %v680_v7, %s1488_s6 }
 0x866   :  { %v683_v8 = vpop.permute.xlu0 %682 }
 0x867   :  { %1329 = vmatmul.mubr.msk.bf16.vlgmr.msra.gmra.mrb[16].mxu1 %vm387_vm4, %v683_v8 }
 0x868   :  { %834 = vmatpush1.bf16.msra.mxu1 %v1590_v17  ;;  %865 = vmatprep.mubr.bf16.mxu1 %v1487_v27 }
 0x869   :  { %835 = vmatprep.subr.bf16.mxu1 %v1596_v18 }
 0x86c   :  { %836 = vmatpush1.bf16.msra.mxu1 %v1608_v20 }
 0x86d   :  { %837 = vmatprep.subr.bf16.mxu1 %v1614_v21 }
 0x870   :  { %838 = vmatpush1.bf16.msra.mxu1 %v1625_v23 }
 0x871   :  { %839 = vmatprep.subr.bf16.mxu1 %v1637_v25 }
 0x874   :  { %840 = vmatpush1.bf16.msra.mxu1 %v1643_v26 }
 0x875   :  { %979 = vmatprep.subr.bf16.mxu1 %v1582_v15 }
 0x93a   :  { %v721_v9 = vpop.f32.mrb[16].mxu1 }
 0x93b   :  { %v728_v10 = vadd.f32 %v721_v9, %v275_v40  ;;  %v723_v11 = vpop.f32.mrb[17].mxu1 }
 0x93c   :  { %v725_v12 = vpop.f32.mrb[18].mxu1  ;;  %v733_v22 = vadd.f32 %v1681_v55, %v723_v11 }
 0x93d   :  { %v729_v13 = vmul.f32 0.5, %v728_v10  ;;  %v726_v14 = vpop.f32.mrb[19].mxu1 }
 0x93f   :  { %1461 = vtanh.f32 %v729_v13 }
 0x949   :  { %v1462_v16 = vpop.eup %1461 }
 0x94a   :  { %v731_v19 = vadd.f32 1.0, %v1462_v16 }
 0x94c   :  { %v732_v37 = vmul.f32 0.5, %v731_v19 }
 0x94e   :  { %v734_v28 = vmul.f32 %v733_v22, %v732_v37  ;;  %v737_v0 = vsub.f32 1.0, %v732_v37  ;;  %v743_v32 = vmul.f32 %v732_v37, %v1816_v5 }
 0x950   :  { %v735_v30 = vadd.f32 %v734_v28, %v277_v24 }
 0x952   :  { %1463 = vtanh.f32 %v735_v30 }
 0x95c   :  { %v1464_v31 = vpop.eup %1463 }
 0x95d   :  { %739 = vrot.lane.b32.xlu1 %v1464_v31, %s1488_s6  ;;  %v289_v31 = vadd.f32 %v1763_v54, %v1683_v56  ;;  %v293_v54 = vadd.f32 %v1765_v57, %v1675_v45 }
 0x9cf   :  { %v740_v38 = vpop.permute.xlu1 %739 }
 0x9d0   :  { %v742_v33 = vmul.f32 %v740_v38, %v737_v0 }
 0x9d2   :  { %v1838_v34 = vadd.f32 %v743_v32, %v742_v33 }
 0x9d4   :  { %v753_v35 = vpack.c.bf16 %v1838_v34, %v1838_v34 }
 0x9d6   :  { %755 = vrot.lane.b32.xlu0 %v753_v35, %s1488_s6 }
 0xa48   :  { %v756_v36 = vpop.permute.xlu0 %755 }
 0xa49   :  { %1330 = vmatmul.mubr.msk.bf16.vlgmr.msra.gmra.mrb[24].mxu0 %vm387_vm4, %v756_v36 }
 0xa4a   :  { %907 = vmatpush1.bf16.msra.mxu0 %v1590_v17  ;;  %938 = vmatprep.mubr.bf16.mxu0 %v1487_v27 }
 0xa4b   :  { %908 = vmatprep.subr.bf16.mxu0 %v1596_v18 }
 0xa4e   :  { %909 = vmatpush1.bf16.msra.mxu0 %v1608_v20 }
 0xa4f   :  { %910 = vmatprep.subr.bf16.mxu0 %v1614_v21 }
 0xa52   :  { %911 = vmatpush1.bf16.msra.mxu0 %v1625_v23 }
 0xa53   :  { %912 = vmatprep.subr.bf16.mxu0 %v1637_v25 }
 0xa56   :  { %913 = vmatpush1.bf16.msra.mxu0 %v1643_v26 }
 0xa57   :  { %1052 = vmatprep.subr.bf16.mxu0 %v1582_v15 }
 0xb1c   :  { %v794_v41 = vpop.f32.mrb[24].mxu0 }
 0xb1d   :  { %v801_v42 = vadd.f32 %v794_v41, %v281_v50  ;;  %v796_v43 = vpop.f32.mrb[25].mxu0 }
 0xb1e   :  { %v798_v44 = vpop.f32.mrb[26].mxu0  ;;  %v806_v39 = vadd.f32 %v1681_v55, %v796_v43 }
 0xb1f   :  { %v802_v46 = vmul.f32 0.5, %v801_v42  ;;  %v799_v47 = vpop.f32.mrb[27].mxu0 }
 0xb21   :  { %1465 = vtanh.f32 %v802_v46 }
 0xb2b   :  { %v1466_v49 = vpop.eup %1465 }
 0xb2c   :  { %v804_v63 = vadd.f32 1.0, %v1466_v49 }
 0xb2e   :  { %v805_v1 = vmul.f32 0.5, %v804_v63 }
 0xb30   :  { %v807_v3 = vmul.f32 %v806_v39, %v805_v1  ;;  %v810_v51 = vsub.f32 1.0, %v805_v1  ;;  %v816_v8 = vmul.f32 %v805_v1, %v1838_v34 }
 0xb32   :  { %v808_v15 = vadd.f32 %v807_v3, %v283_v2 }
 0xb34   :  { %1467 = vtanh.f32 %v808_v15 }
 0xb3e   :  { %v1468_v4 = vpop.eup %1467 }
 0xb3f   :  { %812 = vrot.lane.b32.xlu1 %v1468_v4, %s1488_s6 }
 0xbb1   :  { %v813_v7 = vpop.permute.xlu1 %812 }
 0xbb2   :  { %v815_v40 = vmul.f32 %v813_v7, %v810_v51 }
 0xbb4   :  { %v1860_v9 = vadd.f32 %v816_v8, %v815_v40 }
 0xbb6   :  { %v826_v10 = vpack.c.bf16 %v1860_v9, %v1860_v9 }
 0xbb8   :  { %828 = vrot.lane.b32.xlu0 %v826_v10, %s1488_s6 }
 0xc2a   :  { %v829_v11 = vpop.permute.xlu0 %828 }
 0xc2b   :  { %1331 = vmatmul.mubr.msk.bf16.vlgmr.msra.gmra.mrb[20].mxu1 %vm387_vm4, %v829_v11 }
 0xc2c   :  { %980 = vmatpush1.bf16.msra.mxu1 %v1590_v17  ;;  %1011 = vmatprep.mubr.bf16.mxu1 %v1487_v27 }
 0xc2d   :  { %981 = vmatprep.subr.bf16.mxu1 %v1596_v18 }
 0xc30   :  { %982 = vmatpush1.bf16.msra.mxu1 %v1608_v20 }
 0xc31   :  { %983 = vmatprep.subr.bf16.mxu1 %v1614_v21 }
 0xc34   :  { %984 = vmatpush1.bf16.msra.mxu1 %v1625_v23 }
 0xc35   :  { %985 = vmatprep.subr.bf16.mxu1 %v1637_v25 }
 0xc38   :  { %986 = vmatpush1.bf16.msra.mxu1 %v1643_v26 }
 0xcfe   :  { %v867_v12 = vpop.f32.mrb[20].mxu1 }
 0xcff   :  { %v874_v13 = vadd.f32 %v867_v12, %v287_v52  ;;  %v869_v14 = vpop.f32.mrb[21].mxu1 }
 0xd00   :  { %v871_v16 = vpop.f32.mrb[22].mxu1  ;;  %v879_v30 = vadd.f32 %v1681_v55, %v869_v14 }
 0xd01   :  { %v875_v19 = vmul.f32 0.5, %v874_v13  ;;  %v872_v37 = vpop.f32.mrb[23].mxu1  ;;  %v301_v16 = vadd.f32 %v1771_v60, %v1683_v56  ;;  %v1919_v60 = vadd.f32 %v1748_v48, %v1689_v6 }
 0xd03   :  { %1469 = vtanh.f32 %v875_v19 }
 0xd0d   :  { %v1470_v22 = vpop.eup %1469 }
 0xd0e   :  { %v877_v24 = vadd.f32 1.0, %v1470_v22 }
 0xd10   :  { %v878_v28 = vmul.f32 0.5, %v877_v24 }
 0xd12   :  { %v880_v0 = vmul.f32 %v879_v30, %v878_v28  ;;  %v883_v53 = vsub.f32 1.0, %v878_v28  ;;  %v889_v35 = vmul.f32 %v878_v28, %v1860_v9 }
 0xd14   :  { %v881_v38 = vadd.f32 %v880_v0, %v289_v31 }
 0xd16   :  { %1471 = vtanh.f32 %v881_v38  ;;  %v599_v38 = vadd.f32 %v1794_v29, %v1919_v60 }
 0xd20   :  { %v1472_v32 = vpop.eup %1471 }
 0xd21   :  { %885 = vrot.lane.b32.xlu1 %v1472_v32, %s1488_s6  ;;  %v672_v32 = vadd.f32 %v1816_v5, %v599_v38 }
 0xd93   :  { %v886_v33 = vpop.permute.xlu1 %885 }
 0xd94   :  { %v888_v36 = vmul.f32 %v886_v33, %v883_v53  ;;  %v745_v53 = vadd.f32 %v1838_v34, %v672_v32 }
 0xd96   :  { %v1881_v50 = vadd.f32 %v889_v35, %v888_v36  ;;  %v818_v33 = vadd.f32 %v1860_v9, %v745_v53 }
 0xd98   :  { %v899_v41 = vpack.c.bf16 %v1881_v50, %v1881_v50  ;;  %v891_v35 = vadd.f32 %v1881_v50, %v818_v33 }
 0xd9a   :  { %901 = vrot.lane.b32.xlu0 %v899_v41, %s1488_s6 }
 0xe0c   :  { %v902_v42 = vpop.permute.xlu0 %901 }
 0xe0d   :  { %1332 = vmatmul.mubr.msk.bf16.vlgmr.msra.gmra.mrb[28].mxu0 %vm387_vm4, %v902_v42  ;;  %v1126_v42 = vld [vmem:[%s2072_s8] sm:$0xff] }
 0xe0e   :  { %1053 = vmatpush1.bf16.msra.mxu0 %v1590_v17  ;;  %1084 = vmatprep.mubr.bf16.mxu0 %v1487_v27 }
 0xe0f   :  { %1054 = vmatprep.subr.bf16.mxu0 %v1596_v18 }
 0xe12   :  { %1055 = vmatpush1.bf16.msra.mxu0 %v1608_v20 }
 0xe13   :  { %1056 = vmatprep.subr.bf16.mxu0 %v1614_v21 }
 0xe16   :  { %1057 = vmatpush1.bf16.msra.mxu0 %v1625_v23  ;;  %v295_v23 = vadd.f32 %v1767_v58, %v1683_v56  ;;  %v299_v58 = vadd.f32 %v1769_v59, %v1675_v45 }
 0xe17   :  { %1058 = vmatprep.subr.bf16.mxu0 %v1637_v25 }
 0xe1a   :  { %1059 = vmatpush1.bf16.msra.mxu0 %v1643_v26 }
 0xee0   :  { %v940_v43 = vpop.f32.mrb[28].mxu0 }
 0xee1   :  { %v947_v44 = vadd.f32 %v940_v43, %v293_v54  ;;  %v942_v17 = vpop.f32.mrb[29].mxu0  ;;  %v1127_v54 = vld [vmem:[%s2072_s8 + $0x8] sm:$0xff] }
 0xee2   :  { %v944_v46 = vpop.f32.mrb[30].mxu0  ;;  %v952_v21 = vadd.f32 %v1681_v55, %v942_v17  ;;  %v1409_v43 = vpack.c.bf16 %v1127_v54, %v1126_v42  ;;  %v1141_v54 = vld [vmem:[%s2073_s9 + $0x38] sm:$0xff] }
 0xee3   :  { %v948_v27 = vmul.f32 0.5, %v947_v44  ;;  %v945_v47 = vpop.f32.mrb[31].mxu0  ;;  %v305_v44 = vadd.f32 %v1773_v61, %v1675_v45  ;;  %v1129_v45 = vld [vmem:[%s2072_s8 + $0x18] sm:$0xff]  ;;  %v307_v61 = vadd.f32 %v1775_v62, %v1683_v56  ;;  %v1132_v56 = vld [vmem:[%s2072_s8 + $0x30] sm:$0xff] }
 0xee4   :  { %1410 = vmatprep.subr.bf16.mxu1 %v1409_v43  ;;  %v1133_v62 = vld [vmem:[%s2072_s8 + $0x38] sm:$0xff] }
 0xee5   :  { %1473 = vtanh.f32 %v948_v27 }
 0xeef   :  { %v1474_v18 = vpop.eup %1473 }
 0xef0   :  { %v950_v20 = vadd.f32 1.0, %v1474_v18 }
 0xef2   :  { %v951_v49 = vmul.f32 0.5, %v950_v20 }
 0xef4   :  { %v953_v25 = vmul.f32 %v952_v21, %v951_v49  ;;  %v956_v57 = vsub.f32 1.0, %v951_v49  ;;  %v962_v39 = vmul.f32 %v951_v49, %v1881_v50 }
 0xef6   :  { %v954_v26 = vadd.f32 %v953_v25, %v295_v23 }
 0xef8   :  { %1475 = vtanh.f32 %v954_v26  ;;  %v1128_v26 = vld [vmem:[%s2072_s8 + $0x10] sm:$0xff] }
 0xf02   :  { %v1476_v63 = vpop.eup %1475 }
 0xf03   :  { %958 = vrot.lane.b32.xlu1 %v1476_v63, %s1488_s6 }
 0xf75   :  { %v959_v1 = vpop.permute.xlu1 %958 }
 0xf76   :  { %v961_v2 = vmul.f32 %v959_v1, %v956_v57  ;;  %v1413_v57 = vpack.c.bf16 %v1129_v45, %v1128_v26 }
 0xf78   :  { %v963_v3 = vadd.f32 %v962_v39, %v961_v2  ;;  %v1131_v39 = vld [vmem:[%s2072_s8 + $0x28] sm:$0xff] }
 0xf7a   :  { %v972_v15 = vpack.c.bf16 %v963_v3, %v963_v3  ;;  %v964_v36 = vadd.f32 %v963_v3, %v891_v35 }
 0xf7c   :  { %974 = vrot.lane.b32.xlu0 %v972_v15, %s1488_s6 }
 0xfee   :  { %v975_v4 = vpop.permute.xlu0 %974 }
 0xfef   :  { %1333 = vmatmul.mubr.msk.bf16.vlgmr.msra.gmra.mrb[24].mxu1 %vm387_vm4, %v975_v4 }
 0xff0   :  { %1412 = vmatpush3.bf16.msra.mxu1 %v1409_v43  ;;  %v1140_v43 = vld [vmem:[%s2073_s9 + $0x30] sm:$0xff] }
 0xff1   :  { %1414 = vmatprep.subr.bf16.mxu1 %v1413_v57 }
 0xff4   :  { %1416 = vmatpush3.bf16.msra.mxu1 %v1413_v57 }
0x10c2   :  { %v1013_v51 = vpop.f32.mrb[24].mxu1 }
0x10c3   :  { %v1020_v7 = vadd.f32 %v1013_v51, %v299_v58  ;;  %v1015_v8 = vpop.f32.mrb[25].mxu1 }
0x10c4   :  { %v1017_v40 = vpop.f32.mrb[26].mxu1  ;;  %v1025_v14 = vadd.f32 %v1681_v55, %v1015_v8 }
0x10c5   :  { %v1021_v10 = vmul.f32 0.5, %v1020_v7  ;;  %v1018_v11 = vpop.f32.mrb[27].mxu1 }
0x10c7   :  { %1477 = vtanh.f32 %v1021_v10 }
0x10d1   :  { %v1478_v52 = vpop.eup %1477 }
0x10d2   :  { %v1023_v12 = vadd.f32 1.0, %v1478_v52 }
0x10d4   :  { %v1024_v13 = vmul.f32 0.5, %v1023_v12 }
0x10d6   :  { %v1026_v19 = vmul.f32 %v1025_v14, %v1024_v13  ;;  %v1029_v59 = vsub.f32 1.0, %v1024_v13  ;;  %v1035_v28 = vmul.f32 %v1024_v13, %v963_v3  ;;  %v1421_v3 = vpack.c.bf16 %v1133_v62, %v1132_v56 }
0x10d8   :  { %v1027_v37 = vadd.f32 %v1026_v19, %v301_v16 }
0x10da   :  { %1479 = vtanh.f32 %v1027_v37 }
0x10e4   :  { %v1480_v22 = vpop.eup %1479 }
0x10e5   :  { %1031 = vrot.lane.b32.xlu1 %v1480_v22, %s1488_s6 }
0x1157   :  { %v1032_v24 = vpop.permute.xlu1 %1031 }
0x1158   :  { %v1034_v30 = vmul.f32 %v1032_v24, %v1029_v59 }
0x115a   :  { %v1910_v31 = vadd.f32 %v1035_v28, %v1034_v30 }
0x115c   :  { %v1045_v0 = vpack.c.bf16 %v1910_v31, %v1910_v31 }
0x115e   :  { %1047 = vrot.lane.b32.xlu0 %v1045_v0, %s1488_s6  ;;  %v1134_v0 = vld [vmem:[%s2073_s9] sm:$0xff] }
0x1162   :  { %455 = vrot.lane.b32.xlu0 %v1689_v6, %s1488_s6  ;;  %v1931_v6 = vadd.f32 %v1910_v31, %v964_v36 }
0x1166   :  { %601 = vrot.lane.b32.xlu0 %v599_v38, %s1488_s6 }
0x116a   :  { %747 = vrot.lane.b32.xlu0 %v745_v53, %s1488_s6 }
0x116e   :  { %893 = vrot.lane.b32.xlu0 %v891_v35, %s1488_s6  ;;  %v1136_v35 = vld [vmem:[%s2073_s9 + $0x10] sm:$0xff] }
0x1172   :  { %1039 = vrot.lane.b32.xlu0 %v1931_v6, %s1488_s6 }
0x11d0   :  { %v1048_v48 = vpop.permute.xlu0 %1047 }
0x11d1   :  { %1334 = vmatmul.mubr.msk.bf16.vlgmr.msra.gmra.mrb[32].mxu0 %vm387_vm4, %v1048_v48 }
0x11d4   :  { %v456_v29 = vpop.permute.xlu0 %455 }
0x11d5   :  { %458 = vst.msk [vmem:[#allocation3] sm:$0xff] %vm387_vm4, %v456_v29 }
0x11d8   :  { %v602_v5 = vpop.permute.xlu0 %601 }
0x11d9   :  { %604 = vst.msk [vmem:[#allocation3 + $0x10] sm:$0xff] %vm387_vm4, %v602_v5  ;;  %v1139_v5 = vld [vmem:[%s2073_s9 + $0x28] sm:$0xff] }
0x11dc   :  { %v748_v34 = vpop.permute.xlu0 %747  ;;  %v1116_v9 = vld [vmem:[#allocation3] sm:$0xff] }
0x11dd   :  { %750 = vst.msk [vmem:[#allocation3 + $0x20] sm:$0xff] %vm387_vm4, %v748_v34  ;;  %1386 = vmatprep.mubr.msk.f32.mxu1 %vm387_vm4, %v1116_v9  ;;  %v1138_v34 = vld [vmem:[%s2073_s9 + $0x20] sm:$0xff] }
0x11e0   :  { %v894_v50 = vpop.permute.xlu0 %893  ;;  %v1118_v13 = vld [vmem:[#allocation3 + $0x10] sm:$0xff] }
0x11e1   :  { %896 = vst.msk [vmem:[#allocation3 + $0x30] sm:$0xff] %vm387_vm4, %v894_v50 }
0x11e4   :  { %v1040_v41 = vpop.permute.xlu0 %1039  ;;  %v1120_v19 = vld [vmem:[#allocation3 + $0x20] sm:$0xff] }
0x11e5   :  { %1042 = vst.msk [vmem:[#allocation3 + $0x40] sm:$0xff] %vm387_vm4, %v1040_v41 }
0x11e8   :  { %v1122_v22 = vld [vmem:[#allocation3 + $0x30] sm:$0xff] }
0x11ec   :  { %v1124_v24 = vld [vmem:[#allocation3 + $0x40] sm:$0xff] }
0x12a4   :  { %v1086_v17 = vpop.f32.mrb[32].mxu0 }
0x12a5   :  { %v1093_v46 = vadd.f32 %v1086_v17, %v305_v44  ;;  %v1088_v27 = vpop.f32.mrb[33].mxu0 }
0x12a6   :  { %v1090_v47 = vpop.f32.mrb[34].mxu0  ;;  %v1098_v25 = vadd.f32 %v1681_v55, %v1088_v27  ;;  %v1130_v55 = vld [vmem:[%s2072_s8 + $0x20] sm:$0xff] }
0x12a7   :  { %v1094_v18 = vmul.f32 0.5, %v1093_v46  ;;  %v1091_v20 = vpop.f32.mrb[35].mxu0  ;;  %v1417_v2 = vpack.c.bf16 %v1131_v39, %v1130_v55  ;;  %v1143_v47 = vld [vmem:[%s2073_s9 + $0x48] sm:$0xff] }
0x12a9   :  { %1481 = vtanh.f32 %v1094_v18  ;;  %1418 = vmatprep.subr.bf16.mxu1 %v1417_v2  ;;  %v1142_v18 = vld [vmem:[%s2073_s9 + $0x40] sm:$0xff] }
0x12aa   :  { %1420 = vmatpush3.bf16.msra.mxu1 %v1417_v2 }
0x12ab   :  { %1422 = vmatprep.subr.bf16.mxu1 %v1421_v3 }
0x12ae   :  { %1424 = vmatpush3.bf16.msra.mxu1 %v1421_v3 }
0x12b3   :  { %v1482_v49 = vpop.eup %1481 }
0x12b4   :  { %v1096_v21 = vadd.f32 1.0, %v1482_v49 }
0x12b6   :  { %v1097_v23 = vmul.f32 0.5, %v1096_v21 }
0x12b8   :  { %v1099_v63 = vmul.f32 %v1098_v25, %v1097_v23  ;;  %v1102_v4 = vsub.f32 1.0, %v1097_v23  ;;  %v1108_v51 = vmul.f32 %v1097_v23, %v1910_v31  ;;  %v1135_v31 = vld [vmem:[%s2073_s9 + $0x8] sm:$0xff] }
0x12ba   :  { %v1100_v1 = vadd.f32 %v1099_v63, %v307_v61 }
0x12bc   :  { %1483 = vtanh.f32 %v1100_v1 }
0x12c6   :  { %v1484_v15 = vpop.eup %1483 }
0x12c7   :  { %1104 = vrot.lane.b32.xlu1 %v1484_v15, %s1488_s6 }
0x12cb   :  { %528 = vrot.lane.b32.xlu1 %v1919_v60, %s1488_s6 }
0x12cf   :  { %674 = vrot.lane.b32.xlu1 %v672_v32, %s1488_s6 }
0x12d3   :  { %820 = vrot.lane.b32.xlu1 %v818_v33, %s1488_s6  ;;  %v1137_v33 = vld [vmem:[%s2073_s9 + $0x18] sm:$0xff] }
0x12d7   :  { %966 = vrot.lane.b32.xlu1 %v964_v36, %s1488_s6 }
0x1339   :  { %v1105_v58 = vpop.permute.xlu1 %1104 }
0x133a   :  { %v1107_v7 = vmul.f32 %v1105_v58, %v1102_v4 }
0x133c   :  { %v1109_v8 = vadd.f32 %v1108_v51, %v1107_v7 }
0x133d   :  { %v529_v40 = vpop.permute.xlu1 %528 }
0x133e   :  { %531 = vst.msk [vmem:[#allocation3 + $0x8] sm:$0xff] %vm387_vm4, %v529_v40  ;;  %v1110_v10 = vadd.f32 %v1109_v8, %v1931_v6 }
0x1340   :  { %1112 = vrot.lane.b32.xlu1 %v1110_v10, %s1488_s6 }
0x1341   :  { %v675_v11 = vpop.permute.xlu1 %674 }
0x1342   :  { %677 = vst.msk [vmem:[#allocation3 + $0x18] sm:$0xff] %vm387_vm4, %v675_v11 }
0x1345   :  { %v821_v52 = vpop.permute.xlu1 %820  ;;  %v1117_v12 = vld [vmem:[#allocation3 + $0x8] sm:$0xff] }
0x1346   :  { %823 = vst.msk [vmem:[#allocation3 + $0x28] sm:$0xff] %vm387_vm4, %v821_v52  ;;  %1387 = vmatmul.mubr.msk.f32.vlgmr.msra.gmra.mrb[28].mxu1 %vm387_vm4, %v1117_v12 }
0x1347   :  { %1389 = vmatprep.mubr.msk.f32.mxu1 %vm387_vm4, %v1118_v13 }
0x1349   :  { %v967_v14 = vpop.permute.xlu1 %966  ;;  %v1119_v16 = vld [vmem:[#allocation3 + $0x18] sm:$0xff] }
0x134a   :  { %969 = vst.msk [vmem:[#allocation3 + $0x38] sm:$0xff] %vm387_vm4, %v967_v14  ;;  %1390 = vmatmul.mubr.msk.f32.gmra.mrb[30].mxu1 %vm387_vm4, %v1119_v16 }
0x134b   :  { %1392 = vmatprep.mubr.msk.f32.mxu1 %vm387_vm4, %v1120_v19 }
0x134d   :  { %v1121_v37 = vld [vmem:[#allocation3 + $0x28] sm:$0xff] }
0x134e   :  { %1393 = vmatmul.mubr.msk.f32.gmra.mrb[32].mxu1 %vm387_vm4, %v1121_v37 }
0x134f   :  { %1395 = vmatprep.mubr.msk.f32.mxu1 %vm387_vm4, %v1122_v22 }
0x1351   :  { %v1123_v59 = vld [vmem:[#allocation3 + $0x38] sm:$0xff] }
0x1352   :  { %1396 = vmatmul.mubr.msk.f32.gmra.mrb[34].mxu1 %vm387_vm4, %v1123_v59 }
0x1353   :  { %1398 = vmatprep.mubr.msk.f32.mxu1 %vm387_vm4, %v1124_v24 }
0x13b2   :  { %v1113_v28 = vpop.permute.xlu1 %1112 }
0x13b3   :  { %1115 = vst.msk [vmem:[#allocation3 + $0x48] sm:$0xff] %vm387_vm4, %v1113_v28 }
0x13ba   :  { %v1125_v30 = vld [vmem:[#allocation3 + $0x48] sm:$0xff] }
0x13bb   :  { %1399 = vmatmul.mubr.msk.f32.gmra.mrb[36].mxu1 %vm387_vm4, %v1125_v30 }
0x1419   :  { %v1388_v60 = vpop.f32.mrb[28].mxu1 }
0x141a   :  { %v1246_v38 = vadd.f32 %v1388_v60, %v1135_v31  ;;  %v1240_v32 = vpop.f32.mrb[29].mxu1 }
0x141b   :  { %v1241_v53 = vadd.f32 %v1240_v32, %v1134_v0 }
0x141c   :  { %1290 = vst.msk [vmem:[%s2074_s10 + $0x8] sm:$0xff] %vm45_vm1, %v1246_v38 }
0x141d   :  { %1289 = vst.msk [vmem:[%s2074_s10] sm:$0xff] %vm45_vm1, %v1241_v53  ;;  %v1391_v36 = vpop.f32.mrb[30].mxu1 }
0x141e   :  { %v1256_v6 = vadd.f32 %v1391_v36, %v1137_v33  ;;  %v1250_v48 = vpop.f32.mrb[31].mxu1 }
0x141f   :  { %v1251_v29 = vadd.f32 %v1250_v48, %v1136_v35 }
0x1420   :  { %1292 = vst.msk [vmem:[%s2074_s10 + $0x18] sm:$0xff] %vm45_vm1, %v1256_v6 }
0x1421   :  { %1291 = vst.msk [vmem:[%s2074_s10 + $0x10] sm:$0xff] %vm45_vm1, %v1251_v29  ;;  %v1394_v9 = vpop.f32.mrb[32].mxu1 }
0x1422   :  { %v1266_v50 = vadd.f32 %v1394_v9, %v1139_v5  ;;  %v1260_v41 = vpop.f32.mrb[33].mxu1 }
0x1423   :  { %v1261_v42 = vadd.f32 %v1260_v41, %v1138_v34 }
0x1424   :  { %1294 = vst.msk [vmem:[%s2074_s10 + $0x28] sm:$0xff] %vm45_vm1, %v1266_v50 }
0x1425   :  { %1293 = vst.msk [vmem:[%s2074_s10 + $0x20] sm:$0xff] %vm45_vm1, %v1261_v42  ;;  %v1397_v44 = vpop.f32.mrb[34].mxu1 }
0x1426   :  { %v1276_v17 = vadd.f32 %v1397_v44, %v1141_v54  ;;  %v1270_v46 = vpop.f32.mrb[35].mxu1 }
0x1427   :  { %v1271_v27 = vadd.f32 %v1270_v46, %v1140_v43 }
0x1428   :  { %1296 = vst.msk [vmem:[%s2074_s10 + $0x38] sm:$0xff] %vm45_vm1, %v1276_v17 }
0x1429   :  { %1295 = vst.msk [vmem:[%s2074_s10 + $0x30] sm:$0xff] %vm45_vm1, %v1271_v27 }
0x148e   :  { %v1400_v20 = vpop.f32.mrb[36].mxu1 }
0x148f   :  { %v1286_v49 = vadd.f32 %v1400_v20, %v1143_v47  ;;  %v1280_v21 = vpop.f32.mrb[37].mxu1 }
0x1490   :  { %v1281_v23 = vadd.f32 %v1280_v21, %v1142_v18 }
0x1491   :  { %1298 = vst.msk [vmem:[%s2074_s10 + $0x48] sm:$0xff] %vm45_vm1, %v1286_v49 }
0x1492   :  { %1297 = vst.msk [vmem:[%s2074_s10 + $0x40] sm:$0xff] %vm45_vm1, %v1281_v23 }

</bundles_post_ra>
